<compile_context>
chip_gen: v7x
topology: tpu7x:2x2x1
jax: 0.10.0
libtpu: 0.0.40
codegen_flags: <defaults>
</compile_context>

<pallas_src>
import functools

import jax
import jax.numpy as jnp
from jax.experimental import pallas as pl
from jax.experimental.pallas import tpu as pltpu

BN_EPS = 1e-5
LANE = 128
SUBLANE = 8
N_LAYERS = 9


def _round_up(x, m):
    return (x + m - 1) // m * m


def _layer_dims(in_features):
    f = in_features
    # fc1..fc9 in/out chain.
    return [f, 2 * f, 2 * f, 4 * f, 8 * f, 8 * f, 4 * f, 2 * f, 2 * f, f]


def _usable_vmem_bytes():
    """Generation-aware usable VMEM (v5e/v6e: 128 MiB, v7x: 64 MiB) minus
    headroom for compiler scratch; safe fallback if the query is unavailable."""
    cap = 64 * 1024 * 1024
    try:
        info = pltpu.get_tpu_info()
        c = getattr(info, "vmem_capacity_bytes", None)
        if c:
            cap = int(c)
    except Exception:
        pass
    return int(cap * 0.85)


def _latentnet_kernel(x_ref, vec_ref,
                      w1, w2, w3, w4, w5, w6, w7, w8, w9,
                      o_ref, w_buf, dma_sem,
                      *, offsets, wshapes, b_valid, b_pad):
    w_hbm = (w1, w2, w3, w4, w5, w6, w7, w8, w9)

    def weight_copy(i):
        # HBM -> VMEM copy of layer i's (padded) weight into slot i % 2.
        slot = i % 2
        k, n = wshapes[i]                       # static python ints
        return pltpu.make_async_copy(
            w_hbm[i], w_buf.at[slot, :k, :n], dma_sem.at[slot])

    def vec(name):
        off, n = offsets[name]                  # static, 128-aligned
        return vec_ref[:, off:off + n]          # (1, n) f32

    def batchnorm(h, gamma_name, beta_name):
        # PyTorch BatchNorm1d training-mode stats (biased variance), restricted
        # to the valid batch rows when the batch was padded to the sublane size.
        if b_valid == b_pad:
            mean = jnp.mean(h, axis=0, keepdims=True)
            var = jnp.mean((h - mean) ** 2, axis=0, keepdims=True)
        else:
            row = jax.lax.broadcasted_iota(jnp.int32, h.shape, 0)
            m = (row < b_valid).astype(jnp.float32)
            inv_n = 1.0 / float(b_valid)
            mean = jnp.sum(h * m, axis=0, keepdims=True) * inv_n
            var = jnp.sum(((h - mean) ** 2) * m, axis=0, keepdims=True) * inv_n
        inv = jax.lax.rsqrt(var + BN_EPS)
        return (h - mean) * inv * vec(gamma_name) + vec(beta_name)

    # Prime the weight pipeline: fc1's weight -> slot 0.
    weight_copy(0).start()

    # Activations carried in bf16 (MXU operand dtype); elementwise math in f32.
    h = x_ref[...].astype(jnp.bfloat16)

    for i in range(N_LAYERS):
        if i + 1 < N_LAYERS:
            weight_copy(i + 1).start()          # prefetch next layer's weight
        weight_copy(i).wait()                   # current weight has landed
        slot = i % 2
        k, n = wshapes[i]
        w = w_buf[slot, :k, :n]                 # (k, n) bf16, static slice
        acc = jnp.dot(h, w, preferred_element_type=jnp.float32)
        acc = acc + vec(f"b{i + 1}")
        if i == N_LAYERS - 1:
            # fc9 -> sigmoid -> full lane-dense store.
            o_ref[...] = jax.nn.sigmoid(acc).astype(o_ref.dtype)
        else:
            hf = jax.nn.relu(acc)
            if i == 1:                          # bn1 after relu(fc2)
                hf = batchnorm(hf, "g1", "bt1")
            elif i == 6:                        # bn2 after relu(fc7)
                hf = batchnorm(hf, "g2", "bt2")
            h = hf.astype(jnp.bfloat16)


def init_params(key, in_features):
    """PyTorch-default init. Weights as (in, out) f32, biases (out,) f32."""
    dims = _layer_dims(in_features)
    n_layers = len(dims) - 1
    keys = jax.random.split(key, 2 * n_layers)
    linears = []
    for i in range(n_layers):
        fan_in, fan_out = dims[i], dims[i + 1]
        bound = 1.0 / (fan_in ** 0.5)
        w = jax.random.uniform(keys[2 * i], (fan_in, fan_out),
                               jnp.float32, -bound, bound)
        b = jax.random.uniform(keys[2 * i + 1], (fan_out,),
                               jnp.float32, -bound, bound)
        linears.append((w, b))
    f2 = 2 * in_features
    bn = dict(g1=jnp.ones((f2,), jnp.float32), bt1=jnp.zeros((f2,), jnp.float32),
              g2=jnp.ones((f2,), jnp.float32), bt2=jnp.zeros((f2,), jnp.float32))
    return linears, bn


def pack_params(linears, bn, in_features):
    """Pad to lane-dense shapes, cast weights to bf16, pack small vectors."""
    dims = _layer_dims(in_features)
    pdims = [_round_up(d, LANE) for d in dims]

    weights = []
    for i, (w, _) in enumerate(linears):
        fan_in, fan_out = dims[i], dims[i + 1]
        wp = jnp.zeros((pdims[i], pdims[i + 1]), jnp.float32)
        wp = wp.at[:fan_in, :fan_out].set(w)
        weights.append(wp.astype(jnp.bfloat16))

    # Pack order: b1..b9, g1, bt1, g2, bt2, each zero-padded to its lane width.
    p2 = _round_up(2 * in_features, LANE)
    entries = [(f"b{i + 1}", b, pdims[i + 1]) for i, (_, b) in enumerate(linears)]
    entries += [("g1", bn["g1"], p2), ("bt1", bn["bt1"], p2),
                ("g2", bn["g2"], p2), ("bt2", bn["bt2"], p2)]

    offsets, chunks, off = {}, [], 0
    for name, v, pn in entries:
        vp = jnp.zeros((pn,), jnp.float32).at[:v.shape[0]].set(v)
        chunks.append(vp)
        offsets[name] = (off, pn)
        off += pn
    vec_pack = jnp.concatenate(chunks)[None, :]  # (1, total) f32, total % 128 == 0

    return dict(weights=weights, vec=vec_pack, offsets=offsets,
                dims=dims, pdims=pdims)


def latentnet_forward(x, packed):
    """x: (B, F) float32; packed: output of pack_params."""
    B, F = x.shape
    dims, pdims = packed["dims"], packed["pdims"]
    assert F == dims[0]
    B_pad = _round_up(max(B, SUBLANE), SUBLANE)

    x_pad = jnp.zeros((B_pad, pdims[0]), jnp.float32).at[:B, :F].set(x)

    weights = packed["weights"]
    wshapes = tuple((int(w.shape[0]), int(w.shape[1])) for w in weights)
    k_max = max(s[0] for s in wshapes)
    n_max = max(s[1] for s in wshapes)

    kernel = functools.partial(_latentnet_kernel,
                               offsets=packed["offsets"],
                               wshapes=wshapes,
                               b_valid=B, b_pad=B_pad)

    out_shape = jax.ShapeDtypeStruct((B_pad, pdims[-1]), jnp.float32)

    # ---- VMEM budget from the actual peak live set --------------------------
    w_buf_bytes = 2 * k_max * n_max * 2                 # bf16 2-slot weight buffer
    x_bytes = B_pad * pdims[0] * 4
    vec_bytes = int(packed["vec"].size) * 4
    out_bytes = B_pad * pdims[-1] * 4
    act_bytes = 6 * B_pad * n_max * 4                   # h(bf16)+acc(f32)+BN temps
    vmem_need = (w_buf_bytes + x_bytes + vec_bytes + out_bytes + act_bytes
                 + (2 << 20))                           # margin for compiler temps
    vmem_limit = int(min(_usable_vmem_bytes(), max(vmem_need, 32 * 1024 * 1024)))

    # ---- Cost estimate (padded shapes) --------------------------------------
    flops = int(2 * B_pad * sum(pdims[i] * pdims[i + 1] for i in range(N_LAYERS)))
    transcendentals = int(B_pad * pdims[-1] + 2 * pdims[2])   # sigmoid + BN rsqrt
    weight_bytes = sum(k * n * 2 for k, n in wshapes)
    bytes_accessed = int(weight_bytes + x_bytes + vec_bytes + out_bytes)

    vmem_spec = pl.BlockSpec(memory_space=pltpu.MemorySpace.VMEM)
    hbm_spec = pl.BlockSpec(memory_space=pl.ANY)        # weights stay in HBM

    out_pad = pl.pallas_call(
        kernel,
        out_shape=out_shape,
        in_specs=[vmem_spec, vmem_spec] + [hbm_spec] * N_LAYERS,
        out_specs=vmem_spec,
        scratch_shapes=[
            pltpu.VMEM((2, k_max, n_max), jnp.bfloat16),  # streamed-weight buffer
            pltpu.SemaphoreType.DMA((2,)),
        ],
        compiler_params=pltpu.CompilerParams(vmem_limit_bytes=vmem_limit),
        cost_estimate=pl.CostEstimate(flops=flops,
                                      transcendentals=transcendentals,
                                      bytes_accessed=bytes_accessed),
    )(x_pad, packed["vec"], *weights)
    return out_pad[:B, :F]


def _reference_forward(x, linears, bn):
    """Pure-JAX reference using the same bf16 matmul-operand quantization."""
    def lin(h, w, b):
        return jnp.dot(h.astype(jnp.bfloat16), w.astype(jnp.bfloat16),
                       preferred_element_type=jnp.float32) + b[None, :]

    def bnorm(h, g, bt):
        m = jnp.mean(h, axis=0, keepdims=True)
        v = jnp.mean((h - m) ** 2, axis=0, keepdims=True)
        return (h - m) * jax.lax.rsqrt(v + BN_EPS) * g[None, :] + bt[None, :]

    (w1, b1), (w2, b2), (w3, b3), (w4, b4), (w5, b5), (w6, b6), \
        (w7, b7), (w8, b8), (w9, b9) = linears
    h = jax.nn.relu(lin(x, w1, b1))
    h = jax.nn.relu(lin(h, w2, b2))
    h = bnorm(h, bn["g1"], bn["bt1"])
    h = jax.nn.relu(lin(h, w3, b3))
    h = jax.nn.relu(lin(h, w4, b4))
    h = jax.nn.relu(lin(h, w5, b5))
    h = jax.nn.relu(lin(h, w6, b6))
    h = jax.nn.relu(lin(h, w7, b7))
    h = bnorm(h, bn["g2"], bn["bt2"])
    h = jax.nn.relu(lin(h, w8, b8))
    return jax.nn.sigmoid(lin(h, w9, b9))


if __name__ == "__main__":
    key = jax.random.PRNGKey(0)
    k_x, k_p = jax.random.split(key)

    # B deliberately NOT a multiple of 8: exercises the masked-BatchNorm path.
    batch = 13
    in_features = 32
    x = jax.random.normal(k_x, (batch, in_features), jnp.float32)

    linears, bn = init_params(k_p, in_features)
    packed = pack_params(linears, bn, in_features)

    out = latentnet_forward(x, packed)
    out = jax.block_until_ready(out)

    ref = _reference_forward(x, linears, bn)
    assert out.shape == (batch, in_features), out.shape
    max_err = float(jnp.max(jnp.abs(out - ref)))
    # bf16 matmul operands -> tolerance loosened relative to an all-f32 check.
    assert jnp.allclose(out, ref, atol=1e-2, rtol=1e-2), \
        f"mismatch vs reference (max abs err {max_err})"

    print("KERNEL_OK")
</pallas_src>

<mosaic_0001>
module attributes {stable_mosaic.version = 11 : i64} {
  func.func @_latentnet_kernel(%arg0: memref<16x128xf32, #tpu.memory_space<vmem>>, %arg1: memref<1x1920xf32, #tpu.memory_space<vmem>>, %arg2: memref<128x128xbf16, #tpu.memory_space<any>>, %arg3: memref<128x128xbf16, #tpu.memory_space<any>>, %arg4: memref<128x128xbf16, #tpu.memory_space<any>>, %arg5: memref<128x256xbf16, #tpu.memory_space<any>>, %arg6: memref<256x256xbf16, #tpu.memory_space<any>>, %arg7: memref<256x128xbf16, #tpu.memory_space<any>>, %arg8: memref<128x128xbf16, #tpu.memory_space<any>>, %arg9: memref<128x128xbf16, #tpu.memory_space<any>>, %arg10: memref<128x128xbf16, #tpu.memory_space<any>>, %arg11: memref<16x128xf32, #tpu.memory_space<vmem>>, %arg12: memref<2x256x256xbf16, #tpu.memory_space<vmem>>, %arg13: memref<2x!tpu.dma_semaphore, #tpu.memory_space<semaphore_mem>>) attributes {dimension_semantics = [], scalar_prefetch = 0 : i64, scratch_operands = 2 : i64, tpu.core_type = #tpu.core_type<tc>} {
    %c0_i32 = arith.constant 0 : i32
    %c0_i32_0 = arith.constant 0 : i32
    %c0_i32_1 = arith.constant 0 : i32
    %c0_i32_2 = arith.constant 0 : i32
    %0 = tpu.memref_slice %arg12[%c0_i32, %c0_i32_1, %c0_i32_2] : memref<2x256x256xbf16, #tpu.memory_space<vmem>> -> memref<1x128x128xbf16, #tpu.memory_space<vmem>>
    %1 = tpu.memref_squeeze %0 : memref<1x128x128xbf16, #tpu.memory_space<vmem>> -> memref<128x128xbf16, #tpu.memory_space<vmem>>
    %2 = tpu.memref_slice %arg13[%c0_i32_0] : memref<2x!tpu.dma_semaphore, #tpu.memory_space<semaphore_mem>> -> memref<1x!tpu.dma_semaphore, #tpu.memory_space<semaphore_mem>>
    %3 = tpu.memref_squeeze %2 : memref<1x!tpu.dma_semaphore, #tpu.memory_space<semaphore_mem>> -> memref<!tpu.dma_semaphore, #tpu.memory_space<semaphore_mem>>
    tpu.enqueue_dma source(%arg2 : memref<128x128xbf16, #tpu.memory_space<any>>) target(%1 : memref<128x128xbf16, #tpu.memory_space<vmem>>) target_semaphore(%3 : memref<!tpu.dma_semaphore, #tpu.memory_space<semaphore_mem>>)
    %c0 = arith.constant 0 : index
    %c0_3 = arith.constant 0 : index
    %4 = vector.load %arg0[%c0, %c0_3] : memref<16x128xf32, #tpu.memory_space<vmem>>, vector<16x128xf32>
    %5 = arith.truncf %4 : vector<16x128xf32> to vector<16x128xbf16>
    %c1_i32 = arith.constant 1 : i32
    %c1_i32_4 = arith.constant 1 : i32
    %c0_i32_5 = arith.constant 0 : i32
    %c0_i32_6 = arith.constant 0 : i32
    %6 = tpu.memref_slice %arg12[%c1_i32, %c0_i32_5, %c0_i32_6] : memref<2x256x256xbf16, #tpu.memory_space<vmem>> -> memref<1x128x128xbf16, #tpu.memory_space<vmem>>
    %7 = tpu.memref_squeeze %6 : memref<1x128x128xbf16, #tpu.memory_space<vmem>> -> memref<128x128xbf16, #tpu.memory_space<vmem>>
    %8 = tpu.memref_slice %arg13[%c1_i32_4] : memref<2x!tpu.dma_semaphore, #tpu.memory_space<semaphore_mem>> -> memref<1x!tpu.dma_semaphore, #tpu.memory_space<semaphore_mem>>
    %9 = tpu.memref_squeeze %8 : memref<1x!tpu.dma_semaphore, #tpu.memory_space<semaphore_mem>> -> memref<!tpu.dma_semaphore, #tpu.memory_space<semaphore_mem>>
    tpu.enqueue_dma source(%arg3 : memref<128x128xbf16, #tpu.memory_space<any>>) target(%7 : memref<128x128xbf16, #tpu.memory_space<vmem>>) target_semaphore(%9 : memref<!tpu.dma_semaphore, #tpu.memory_space<semaphore_mem>>)
    %c0_i32_7 = arith.constant 0 : i32
    %c0_i32_8 = arith.constant 0 : i32
    %c0_i32_9 = arith.constant 0 : i32
    %c0_i32_10 = arith.constant 0 : i32
    %10 = tpu.memref_slice %arg12[%c0_i32_7, %c0_i32_9, %c0_i32_10] : memref<2x256x256xbf16, #tpu.memory_space<vmem>> -> memref<1x128x128xbf16, #tpu.memory_space<vmem>>
    %11 = tpu.memref_squeeze %10 : memref<1x128x128xbf16, #tpu.memory_space<vmem>> -> memref<128x128xbf16, #tpu.memory_space<vmem>>
    %12 = tpu.memref_slice %arg13[%c0_i32_8] : memref<2x!tpu.dma_semaphore, #tpu.memory_space<semaphore_mem>> -> memref<1x!tpu.dma_semaphore, #tpu.memory_space<semaphore_mem>>
    %13 = tpu.memref_squeeze %12 : memref<1x!tpu.dma_semaphore, #tpu.memory_space<semaphore_mem>> -> memref<!tpu.dma_semaphore, #tpu.memory_space<semaphore_mem>>
    tpu.wait_dma2 semaphore(%13 : memref<!tpu.dma_semaphore, #tpu.memory_space<semaphore_mem>>) src(%arg2 : memref<128x128xbf16, #tpu.memory_space<any>>) dst(%11 : memref<128x128xbf16, #tpu.memory_space<vmem>>)
    %c0_11 = arith.constant 0 : index
    %c0_12 = arith.constant 0 : index
    %c0_13 = arith.constant 0 : index
    %14 = vector.load %arg12[%c0_11, %c0_12, %c0_13] : memref<2x256x256xbf16, #tpu.memory_space<vmem>>, vector<1x128x128xbf16>
    %15 = vector.shape_cast %14 : vector<1x128x128xbf16> to vector<128x128xbf16>
    %cst = arith.constant dense<0.000000e+00> : vector<16x128xf32>
    %16 = tpu.matmul %5, %15, %cst {dimension_numbers = #tpu.dot_dimension_numbers<[1], [0], [0], [1], [0, 0, 1, 1], [], []>} : vector<16x128xbf16>, vector<128x128xbf16>, vector<16x128xf32> -> vector<16x128xf32>
    %c0_14 = arith.constant 0 : index
    %c0_15 = arith.constant 0 : index
    %17 = vector.load %arg1[%c0_14, %c0_15] : memref<1x1920xf32, #tpu.memory_space<vmem>>, vector<1x128xf32>
    %18 = vector.broadcast %17 : vector<1x128xf32> to vector<16x128xf32>
    %19 = arith.addf %16, %18 : vector<16x128xf32>
    %cst_16 = arith.constant 0.000000e+00 : f32
    %20 = vector.broadcast %cst_16 : f32 to vector<16x128xf32>
    %21 = arith.maximumf %19, %20 : vector<16x128xf32>
    %22 = arith.truncf %21 : vector<16x128xf32> to vector<16x128xbf16>
    %c0_i32_17 = arith.constant 0 : i32
    %c0_i32_18 = arith.constant 0 : i32
    %c0_i32_19 = arith.constant 0 : i32
    %c0_i32_20 = arith.constant 0 : i32
    %23 = tpu.memref_slice %arg12[%c0_i32_17, %c0_i32_19, %c0_i32_20] : memref<2x256x256xbf16, #tpu.memory_space<vmem>> -> memref<1x128x128xbf16, #tpu.memory_space<vmem>>
    %24 = tpu.memref_squeeze %23 : memref<1x128x128xbf16, #tpu.memory_space<vmem>> -> memref<128x128xbf16, #tpu.memory_space<vmem>>
    %25 = tpu.memref_slice %arg13[%c0_i32_18] : memref<2x!tpu.dma_semaphore, #tpu.memory_space<semaphore_mem>> -> memref<1x!tpu.dma_semaphore, #tpu.memory_space<semaphore_mem>>
    %26 = tpu.memref_squeeze %25 : memref<1x!tpu.dma_semaphore, #tpu.memory_space<semaphore_mem>> -> memref<!tpu.dma_semaphore, #tpu.memory_space<semaphore_mem>>
    tpu.enqueue_dma source(%arg4 : memref<128x128xbf16, #tpu.memory_space<any>>) target(%24 : memref<128x128xbf16, #tpu.memory_space<vmem>>) target_semaphore(%26 : memref<!tpu.dma_semaphore, #tpu.memory_space<semaphore_mem>>)
    %c1_i32_21 = arith.constant 1 : i32
    %c1_i32_22 = arith.constant 1 : i32
    %c0_i32_23 = arith.constant 0 : i32
    %c0_i32_24 = arith.constant 0 : i32
    %27 = tpu.memref_slice %arg12[%c1_i32_21, %c0_i32_23, %c0_i32_24] : memref<2x256x256xbf16, #tpu.memory_space<vmem>> -> memref<1x128x128xbf16, #tpu.memory_space<vmem>>
    %28 = tpu.memref_squeeze %27 : memref<1x128x128xbf16, #tpu.memory_space<vmem>> -> memref<128x128xbf16, #tpu.memory_space<vmem>>
    %29 = tpu.memref_slice %arg13[%c1_i32_22] : memref<2x!tpu.dma_semaphore, #tpu.memory_space<semaphore_mem>> -> memref<1x!tpu.dma_semaphore, #tpu.memory_space<semaphore_mem>>
    %30 = tpu.memref_squeeze %29 : memref<1x!tpu.dma_semaphore, #tpu.memory_space<semaphore_mem>> -> memref<!tpu.dma_semaphore, #tpu.memory_space<semaphore_mem>>
    tpu.wait_dma2 semaphore(%30 : memref<!tpu.dma_semaphore, #tpu.memory_space<semaphore_mem>>) src(%arg3 : memref<128x128xbf16, #tpu.memory_space<any>>) dst(%28 : memref<128x128xbf16, #tpu.memory_space<vmem>>)
    %c1 = arith.constant 1 : index
    %c0_25 = arith.constant 0 : index
    %c0_26 = arith.constant 0 : index
    %31 = vector.load %arg12[%c1, %c0_25, %c0_26] : memref<2x256x256xbf16, #tpu.memory_space<vmem>>, vector<1x128x128xbf16>
    %32 = vector.shape_cast %31 : vector<1x128x128xbf16> to vector<128x128xbf16>
    %cst_27 = arith.constant dense<0.000000e+00> : vector<16x128xf32>
    %33 = tpu.matmul %22, %32, %cst_27 {dimension_numbers = #tpu.dot_dimension_numbers<[1], [0], [0], [1], [0, 0, 1, 1], [], []>} : vector<16x128xbf16>, vector<128x128xbf16>, vector<16x128xf32> -> vector<16x128xf32>
    %c0_28 = arith.constant 0 : index
    %c128 = arith.constant 128 : index
    %34 = vector.load %arg1[%c0_28, %c128] : memref<1x1920xf32, #tpu.memory_space<vmem>>, vector<1x128xf32>
    %35 = vector.broadcast %34 : vector<1x128xf32> to vector<16x128xf32>
    %36 = arith.addf %33, %35 : vector<16x128xf32>
    %cst_29 = arith.constant 0.000000e+00 : f32
    %37 = vector.broadcast %cst_29 : f32 to vector<16x128xf32>
    %38 = arith.maximumf %36, %37 : vector<16x128xf32>
    %39 = tpu.iota {dimensions = array<i32: 0>} : vector<16x128xi32>
    %c13_i32 = arith.constant 13 : i32
    %40 = vector.broadcast %c13_i32 : i32 to vector<16x128xi32>
    %41 = arith.cmpi slt, %39, %40 : vector<16x128xi32>
    %42 = arith.extui %41 : vector<16x128xi1> to vector<16x128xi32>
    %43 = arith.sitofp %42 : vector<16x128xi32> to vector<16x128xf32>
    %44 = arith.mulf %38, %43 : vector<16x128xf32>
    %cst_30 = arith.constant dense<0.000000e+00> : vector<128xf32>
    %45 = vector.multi_reduction <add>, %44, %cst_30 [0] : vector<16x128xf32> to vector<128xf32>
    %46 = vector.shape_cast %45 : vector<128xf32> to vector<1x128xf32>
    %cst_31 = arith.constant 0.0769230798 : f32
    %47 = vector.broadcast %cst_31 : f32 to vector<1x128xf32>
    %48 = arith.mulf %46, %47 : vector<1x128xf32>
    %49 = vector.broadcast %48 : vector<1x128xf32> to vector<16x128xf32>
    %50 = arith.subf %38, %49 : vector<16x128xf32>
    %51 = arith.mulf %50, %50 : vector<16x128xf32>
    %52 = arith.mulf %51, %43 : vector<16x128xf32>
    %cst_32 = arith.constant dense<0.000000e+00> : vector<128xf32>
    %53 = vector.multi_reduction <add>, %52, %cst_32 [0] : vector<16x128xf32> to vector<128xf32>
    %54 = vector.shape_cast %53 : vector<128xf32> to vector<1x128xf32>
    %cst_33 = arith.constant 0.0769230798 : f32
    %55 = vector.broadcast %cst_33 : f32 to vector<1x128xf32>
    %56 = arith.mulf %54, %55 : vector<1x128xf32>
    %cst_34 = arith.constant 9.99999974E-6 : f32
    %57 = vector.broadcast %cst_34 : f32 to vector<1x128xf32>
    %58 = arith.addf %56, %57 : vector<1x128xf32>
    %59 = math.rsqrt %58 : vector<1x128xf32>
    %60 = vector.broadcast %48 : vector<1x128xf32> to vector<16x128xf32>
    %61 = arith.subf %38, %60 : vector<16x128xf32>
    %62 = vector.broadcast %59 : vector<1x128xf32> to vector<16x128xf32>
    %63 = arith.mulf %61, %62 : vector<16x128xf32>
    %c0_35 = arith.constant 0 : index
    %c1408 = arith.constant 1408 : index
    %64 = vector.load %arg1[%c0_35, %c1408] : memref<1x1920xf32, #tpu.memory_space<vmem>>, vector<1x128xf32>
    %65 = vector.broadcast %64 : vector<1x128xf32> to vector<16x128xf32>
    %66 = arith.mulf %63, %65 : vector<16x128xf32>
    %c0_36 = arith.constant 0 : index
    %c1536 = arith.constant 1536 : index
    %67 = vector.load %arg1[%c0_36, %c1536] : memref<1x1920xf32, #tpu.memory_space<vmem>>, vector<1x128xf32>
    %68 = vector.broadcast %67 : vector<1x128xf32> to vector<16x128xf32>
    %69 = arith.addf %66, %68 : vector<16x128xf32>
    %70 = arith.truncf %69 : vector<16x128xf32> to vector<16x128xbf16>
    %c1_i32_37 = arith.constant 1 : i32
    %c1_i32_38 = arith.constant 1 : i32
    %c0_i32_39 = arith.constant 0 : i32
    %c0_i32_40 = arith.constant 0 : i32
    %71 = tpu.memref_slice %arg12[%c1_i32_37, %c0_i32_39, %c0_i32_40] : memref<2x256x256xbf16, #tpu.memory_space<vmem>> -> memref<1x128x256xbf16, #tpu.memory_space<vmem>>
    %72 = tpu.memref_squeeze %71 : memref<1x128x256xbf16, #tpu.memory_space<vmem>> -> memref<128x256xbf16, #tpu.memory_space<vmem>>
    %73 = tpu.memref_slice %arg13[%c1_i32_38] : memref<2x!tpu.dma_semaphore, #tpu.memory_space<semaphore_mem>> -> memref<1x!tpu.dma_semaphore, #tpu.memory_space<semaphore_mem>>
    %74 = tpu.memref_squeeze %73 : memref<1x!tpu.dma_semaphore, #tpu.memory_space<semaphore_mem>> -> memref<!tpu.dma_semaphore, #tpu.memory_space<semaphore_mem>>
    tpu.enqueue_dma source(%arg5 : memref<128x256xbf16, #tpu.memory_space<any>>) target(%72 : memref<128x256xbf16, #tpu.memory_space<vmem>>) target_semaphore(%74 : memref<!tpu.dma_semaphore, #tpu.memory_space<semaphore_mem>>)
    %c0_i32_41 = arith.constant 0 : i32
    %c0_i32_42 = arith.constant 0 : i32
    %c0_i32_43 = arith.constant 0 : i32
    %c0_i32_44 = arith.constant 0 : i32
    %75 = tpu.memref_slice %arg12[%c0_i32_41, %c0_i32_43, %c0_i32_44] : memref<2x256x256xbf16, #tpu.memory_space<vmem>> -> memref<1x128x128xbf16, #tpu.memory_space<vmem>>
    %76 = tpu.memref_squeeze %75 : memref<1x128x128xbf16, #tpu.memory_space<vmem>> -> memref<128x128xbf16, #tpu.memory_space<vmem>>
    %77 = tpu.memref_slice %arg13[%c0_i32_42] : memref<2x!tpu.dma_semaphore, #tpu.memory_space<semaphore_mem>> -> memref<1x!tpu.dma_semaphore, #tpu.memory_space<semaphore_mem>>
    %78 = tpu.memref_squeeze %77 : memref<1x!tpu.dma_semaphore, #tpu.memory_space<semaphore_mem>> -> memref<!tpu.dma_semaphore, #tpu.memory_space<semaphore_mem>>
    tpu.wait_dma2 semaphore(%78 : memref<!tpu.dma_semaphore, #tpu.memory_space<semaphore_mem>>) src(%arg4 : memref<128x128xbf16, #tpu.memory_space<any>>) dst(%76 : memref<128x128xbf16, #tpu.memory_space<vmem>>)
    %c0_45 = arith.constant 0 : index
    %c0_46 = arith.constant 0 : index
    %c0_47 = arith.constant 0 : index
    %79 = vector.load %arg12[%c0_45, %c0_46, %c0_47] : memref<2x256x256xbf16, #tpu.memory_space<vmem>>, vector<1x128x128xbf16>
    %80 = vector.shape_cast %79 : vector<1x128x128xbf16> to vector<128x128xbf16>
    %cst_48 = arith.constant dense<0.000000e+00> : vector<16x128xf32>
    %81 = tpu.matmul %70, %80, %cst_48 {dimension_numbers = #tpu.dot_dimension_numbers<[1], [0], [0], [1], [0, 0, 1, 1], [], []>} : vector<16x128xbf16>, vector<128x128xbf16>, vector<16x128xf32> -> vector<16x128xf32>
    %c0_49 = arith.constant 0 : index
    %c256 = arith.constant 256 : index
    %82 = vector.load %arg1[%c0_49, %c256] : memref<1x1920xf32, #tpu.memory_space<vmem>>, vector<1x128xf32>
    %83 = vector.broadcast %82 : vector<1x128xf32> to vector<16x128xf32>
    %84 = arith.addf %81, %83 : vector<16x128xf32>
    %cst_50 = arith.constant 0.000000e+00 : f32
    %85 = vector.broadcast %cst_50 : f32 to vector<16x128xf32>
    %86 = arith.maximumf %84, %85 : vector<16x128xf32>
    %87 = arith.truncf %86 : vector<16x128xf32> to vector<16x128xbf16>
    %c0_i32_51 = arith.constant 0 : i32
    %c0_i32_52 = arith.constant 0 : i32
    %c0_i32_53 = arith.constant 0 : i32
    %c0_i32_54 = arith.constant 0 : i32
    %88 = tpu.memref_slice %arg12[%c0_i32_51, %c0_i32_53, %c0_i32_54] : memref<2x256x256xbf16, #tpu.memory_space<vmem>> -> memref<1x256x256xbf16, #tpu.memory_space<vmem>>
    %89 = tpu.memref_squeeze %88 : memref<1x256x256xbf16, #tpu.memory_space<vmem>> -> memref<256x256xbf16, #tpu.memory_space<vmem>>
    %90 = tpu.memref_slice %arg13[%c0_i32_52] : memref<2x!tpu.dma_semaphore, #tpu.memory_space<semaphore_mem>> -> memref<1x!tpu.dma_semaphore, #tpu.memory_space<semaphore_mem>>
    %91 = tpu.memref_squeeze %90 : memref<1x!tpu.dma_semaphore, #tpu.memory_space<semaphore_mem>> -> memref<!tpu.dma_semaphore, #tpu.memory_space<semaphore_mem>>
    tpu.enqueue_dma source(%arg6 : memref<256x256xbf16, #tpu.memory_space<any>>) target(%89 : memref<256x256xbf16, #tpu.memory_space<vmem>>) target_semaphore(%91 : memref<!tpu.dma_semaphore, #tpu.memory_space<semaphore_mem>>)
    %c1_i32_55 = arith.constant 1 : i32
    %c1_i32_56 = arith.constant 1 : i32
    %c0_i32_57 = arith.constant 0 : i32
    %c0_i32_58 = arith.constant 0 : i32
    %92 = tpu.memref_slice %arg12[%c1_i32_55, %c0_i32_57, %c0_i32_58] : memref<2x256x256xbf16, #tpu.memory_space<vmem>> -> memref<1x128x256xbf16, #tpu.memory_space<vmem>>
    %93 = tpu.memref_squeeze %92 : memref<1x128x256xbf16, #tpu.memory_space<vmem>> -> memref<128x256xbf16, #tpu.memory_space<vmem>>
    %94 = tpu.memref_slice %arg13[%c1_i32_56] : memref<2x!tpu.dma_semaphore, #tpu.memory_space<semaphore_mem>> -> memref<1x!tpu.dma_semaphore, #tpu.memory_space<semaphore_mem>>
    %95 = tpu.memref_squeeze %94 : memref<1x!tpu.dma_semaphore, #tpu.memory_space<semaphore_mem>> -> memref<!tpu.dma_semaphore, #tpu.memory_space<semaphore_mem>>
    tpu.wait_dma2 semaphore(%95 : memref<!tpu.dma_semaphore, #tpu.memory_space<semaphore_mem>>) src(%arg5 : memref<128x256xbf16, #tpu.memory_space<any>>) dst(%93 : memref<128x256xbf16, #tpu.memory_space<vmem>>)
    %c1_59 = arith.constant 1 : index
    %c0_60 = arith.constant 0 : index
    %c0_61 = arith.constant 0 : index
    %96 = vector.load %arg12[%c1_59, %c0_60, %c0_61] : memref<2x256x256xbf16, #tpu.memory_space<vmem>>, vector<1x128x256xbf16>
    %97 = vector.shape_cast %96 : vector<1x128x256xbf16> to vector<128x256xbf16>
    %cst_62 = arith.constant dense<0.000000e+00> : vector<16x256xf32>
    %98 = tpu.matmul %87, %97, %cst_62 {dimension_numbers = #tpu.dot_dimension_numbers<[1], [0], [0], [1], [0, 0, 1, 1], [], []>} : vector<16x128xbf16>, vector<128x256xbf16>, vector<16x256xf32> -> vector<16x256xf32>
    %c0_63 = arith.constant 0 : index
    %c384 = arith.constant 384 : index
    %99 = vector.load %arg1[%c0_63, %c384] : memref<1x1920xf32, #tpu.memory_space<vmem>>, vector<1x256xf32>
    %100 = vector.broadcast %99 : vector<1x256xf32> to vector<16x256xf32>
    %101 = arith.addf %98, %100 : vector<16x256xf32>
    %cst_64 = arith.constant 0.000000e+00 : f32
    %102 = vector.broadcast %cst_64 : f32 to vector<16x256xf32>
    %103 = arith.maximumf %101, %102 : vector<16x256xf32>
    %104 = arith.truncf %103 : vector<16x256xf32> to vector<16x256xbf16>
    %c1_i32_65 = arith.constant 1 : i32
    %c1_i32_66 = arith.constant 1 : i32
    %c0_i32_67 = arith.constant 0 : i32
    %c0_i32_68 = arith.constant 0 : i32
    %105 = tpu.memref_slice %arg12[%c1_i32_65, %c0_i32_67, %c0_i32_68] : memref<2x256x256xbf16, #tpu.memory_space<vmem>> -> memref<1x256x128xbf16, #tpu.memory_space<vmem>>
    %106 = tpu.memref_squeeze %105 : memref<1x256x128xbf16, #tpu.memory_space<vmem>> -> memref<256x128xbf16, #tpu.memory_space<vmem>>
    %107 = tpu.memref_slice %arg13[%c1_i32_66] : memref<2x!tpu.dma_semaphore, #tpu.memory_space<semaphore_mem>> -> memref<1x!tpu.dma_semaphore, #tpu.memory_space<semaphore_mem>>
    %108 = tpu.memref_squeeze %107 : memref<1x!tpu.dma_semaphore, #tpu.memory_space<semaphore_mem>> -> memref<!tpu.dma_semaphore, #tpu.memory_space<semaphore_mem>>
    tpu.enqueue_dma source(%arg7 : memref<256x128xbf16, #tpu.memory_space<any>>) target(%106 : memref<256x128xbf16, #tpu.memory_space<vmem>>) target_semaphore(%108 : memref<!tpu.dma_semaphore, #tpu.memory_space<semaphore_mem>>)
    %c0_i32_69 = arith.constant 0 : i32
    %c0_i32_70 = arith.constant 0 : i32
    %c0_i32_71 = arith.constant 0 : i32
    %c0_i32_72 = arith.constant 0 : i32
    %109 = tpu.memref_slice %arg12[%c0_i32_69, %c0_i32_71, %c0_i32_72] : memref<2x256x256xbf16, #tpu.memory_space<vmem>> -> memref<1x256x256xbf16, #tpu.memory_space<vmem>>
    %110 = tpu.memref_squeeze %109 : memref<1x256x256xbf16, #tpu.memory_space<vmem>> -> memref<256x256xbf16, #tpu.memory_space<vmem>>
    %111 = tpu.memref_slice %arg13[%c0_i32_70] : memref<2x!tpu.dma_semaphore, #tpu.memory_space<semaphore_mem>> -> memref<1x!tpu.dma_semaphore, #tpu.memory_space<semaphore_mem>>
    %112 = tpu.memref_squeeze %111 : memref<1x!tpu.dma_semaphore, #tpu.memory_space<semaphore_mem>> -> memref<!tpu.dma_semaphore, #tpu.memory_space<semaphore_mem>>
    tpu.wait_dma2 semaphore(%112 : memref<!tpu.dma_semaphore, #tpu.memory_space<semaphore_mem>>) src(%arg6 : memref<256x256xbf16, #tpu.memory_space<any>>) dst(%110 : memref<256x256xbf16, #tpu.memory_space<vmem>>)
    %c0_73 = arith.constant 0 : index
    %c0_74 = arith.constant 0 : index
    %c0_75 = arith.constant 0 : index
    %113 = vector.load %arg12[%c0_73, %c0_74, %c0_75] : memref<2x256x256xbf16, #tpu.memory_space<vmem>>, vector<1x256x256xbf16>
    %114 = vector.shape_cast %113 : vector<1x256x256xbf16> to vector<256x256xbf16>
    %cst_76 = arith.constant dense<0.000000e+00> : vector<16x256xf32>
    %115 = tpu.matmul %104, %114, %cst_76 {dimension_numbers = #tpu.dot_dimension_numbers<[1], [0], [0], [1], [0, 0, 1, 1], [], []>} : vector<16x256xbf16>, vector<256x256xbf16>, vector<16x256xf32> -> vector<16x256xf32>
    %c0_77 = arith.constant 0 : index
    %c640 = arith.constant 640 : index
    %116 = vector.load %arg1[%c0_77, %c640] : memref<1x1920xf32, #tpu.memory_space<vmem>>, vector<1x256xf32>
    %117 = vector.broadcast %116 : vector<1x256xf32> to vector<16x256xf32>
    %118 = arith.addf %115, %117 : vector<16x256xf32>
    %cst_78 = arith.constant 0.000000e+00 : f32
    %119 = vector.broadcast %cst_78 : f32 to vector<16x256xf32>
    %120 = arith.maximumf %118, %119 : vector<16x256xf32>
    %121 = arith.truncf %120 : vector<16x256xf32> to vector<16x256xbf16>
    %c0_i32_79 = arith.constant 0 : i32
    %c0_i32_80 = arith.constant 0 : i32
    %c0_i32_81 = arith.constant 0 : i32
    %c0_i32_82 = arith.constant 0 : i32
    %122 = tpu.memref_slice %arg12[%c0_i32_79, %c0_i32_81, %c0_i32_82] : memref<2x256x256xbf16, #tpu.memory_space<vmem>> -> memref<1x128x128xbf16, #tpu.memory_space<vmem>>
    %123 = tpu.memref_squeeze %122 : memref<1x128x128xbf16, #tpu.memory_space<vmem>> -> memref<128x128xbf16, #tpu.memory_space<vmem>>
    %124 = tpu.memref_slice %arg13[%c0_i32_80] : memref<2x!tpu.dma_semaphore, #tpu.memory_space<semaphore_mem>> -> memref<1x!tpu.dma_semaphore, #tpu.memory_space<semaphore_mem>>
    %125 = tpu.memref_squeeze %124 : memref<1x!tpu.dma_semaphore, #tpu.memory_space<semaphore_mem>> -> memref<!tpu.dma_semaphore, #tpu.memory_space<semaphore_mem>>
    tpu.enqueue_dma source(%arg8 : memref<128x128xbf16, #tpu.memory_space<any>>) target(%123 : memref<128x128xbf16, #tpu.memory_space<vmem>>) target_semaphore(%125 : memref<!tpu.dma_semaphore, #tpu.memory_space<semaphore_mem>>)
    %c1_i32_83 = arith.constant 1 : i32
    %c1_i32_84 = arith.constant 1 : i32
    %c0_i32_85 = arith.constant 0 : i32
    %c0_i32_86 = arith.constant 0 : i32
    %126 = tpu.memref_slice %arg12[%c1_i32_83, %c0_i32_85, %c0_i32_86] : memref<2x256x256xbf16, #tpu.memory_space<vmem>> -> memref<1x256x128xbf16, #tpu.memory_space<vmem>>
    %127 = tpu.memref_squeeze %126 : memref<1x256x128xbf16, #tpu.memory_space<vmem>> -> memref<256x128xbf16, #tpu.memory_space<vmem>>
    %128 = tpu.memref_slice %arg13[%c1_i32_84] : memref<2x!tpu.dma_semaphore, #tpu.memory_space<semaphore_mem>> -> memref<1x!tpu.dma_semaphore, #tpu.memory_space<semaphore_mem>>
    %129 = tpu.memref_squeeze %128 : memref<1x!tpu.dma_semaphore, #tpu.memory_space<semaphore_mem>> -> memref<!tpu.dma_semaphore, #tpu.memory_space<semaphore_mem>>
    tpu.wait_dma2 semaphore(%129 : memref<!tpu.dma_semaphore, #tpu.memory_space<semaphore_mem>>) src(%arg7 : memref<256x128xbf16, #tpu.memory_space<any>>) dst(%127 : memref<256x128xbf16, #tpu.memory_space<vmem>>)
    %c1_87 = arith.constant 1 : index
    %c0_88 = arith.constant 0 : index
    %c0_89 = arith.constant 0 : index
    %130 = vector.load %arg12[%c1_87, %c0_88, %c0_89] : memref<2x256x256xbf16, #tpu.memory_space<vmem>>, vector<1x256x128xbf16>
    %131 = vector.shape_cast %130 : vector<1x256x128xbf16> to vector<256x128xbf16>
    %cst_90 = arith.constant dense<0.000000e+00> : vector<16x128xf32>
    %132 = tpu.matmul %121, %131, %cst_90 {dimension_numbers = #tpu.dot_dimension_numbers<[1], [0], [0], [1], [0, 0, 1, 1], [], []>} : vector<16x256xbf16>, vector<256x128xbf16>, vector<16x128xf32> -> vector<16x128xf32>
    %c0_91 = arith.constant 0 : index
    %c896 = arith.constant 896 : index
    %133 = vector.load %arg1[%c0_91, %c896] : memref<1x1920xf32, #tpu.memory_space<vmem>>, vector<1x128xf32>
    %134 = vector.broadcast %133 : vector<1x128xf32> to vector<16x128xf32>
    %135 = arith.addf %132, %134 : vector<16x128xf32>
    %cst_92 = arith.constant 0.000000e+00 : f32
    %136 = vector.broadcast %cst_92 : f32 to vector<16x128xf32>
    %137 = arith.maximumf %135, %136 : vector<16x128xf32>
    %138 = arith.truncf %137 : vector<16x128xf32> to vector<16x128xbf16>
    %c1_i32_93 = arith.constant 1 : i32
    %c1_i32_94 = arith.constant 1 : i32
    %c0_i32_95 = arith.constant 0 : i32
    %c0_i32_96 = arith.constant 0 : i32
    %139 = tpu.memref_slice %arg12[%c1_i32_93, %c0_i32_95, %c0_i32_96] : memref<2x256x256xbf16, #tpu.memory_space<vmem>> -> memref<1x128x128xbf16, #tpu.memory_space<vmem>>
    %140 = tpu.memref_squeeze %139 : memref<1x128x128xbf16, #tpu.memory_space<vmem>> -> memref<128x128xbf16, #tpu.memory_space<vmem>>
    %141 = tpu.memref_slice %arg13[%c1_i32_94] : memref<2x!tpu.dma_semaphore, #tpu.memory_space<semaphore_mem>> -> memref<1x!tpu.dma_semaphore, #tpu.memory_space<semaphore_mem>>
    %142 = tpu.memref_squeeze %141 : memref<1x!tpu.dma_semaphore, #tpu.memory_space<semaphore_mem>> -> memref<!tpu.dma_semaphore, #tpu.memory_space<semaphore_mem>>
    tpu.enqueue_dma source(%arg9 : memref<128x128xbf16, #tpu.memory_space<any>>) target(%140 : memref<128x128xbf16, #tpu.memory_space<vmem>>) target_semaphore(%142 : memref<!tpu.dma_semaphore, #tpu.memory_space<semaphore_mem>>)
    %c0_i32_97 = arith.constant 0 : i32
    %c0_i32_98 = arith.constant 0 : i32
    %c0_i32_99 = arith.constant 0 : i32
    %c0_i32_100 = arith.constant 0 : i32
    %143 = tpu.memref_slice %arg12[%c0_i32_97, %c0_i32_99, %c0_i32_100] : memref<2x256x256xbf16, #tpu.memory_space<vmem>> -> memref<1x128x128xbf16, #tpu.memory_space<vmem>>
    %144 = tpu.memref_squeeze %143 : memref<1x128x128xbf16, #tpu.memory_space<vmem>> -> memref<128x128xbf16, #tpu.memory_space<vmem>>
    %145 = tpu.memref_slice %arg13[%c0_i32_98] : memref<2x!tpu.dma_semaphore, #tpu.memory_space<semaphore_mem>> -> memref<1x!tpu.dma_semaphore, #tpu.memory_space<semaphore_mem>>
    %146 = tpu.memref_squeeze %145 : memref<1x!tpu.dma_semaphore, #tpu.memory_space<semaphore_mem>> -> memref<!tpu.dma_semaphore, #tpu.memory_space<semaphore_mem>>
    tpu.wait_dma2 semaphore(%146 : memref<!tpu.dma_semaphore, #tpu.memory_space<semaphore_mem>>) src(%arg8 : memref<128x128xbf16, #tpu.memory_space<any>>) dst(%144 : memref<128x128xbf16, #tpu.memory_space<vmem>>)
    %c0_101 = arith.constant 0 : index
    %c0_102 = arith.constant 0 : index
    %c0_103 = arith.constant 0 : index
    %147 = vector.load %arg12[%c0_101, %c0_102, %c0_103] : memref<2x256x256xbf16, #tpu.memory_space<vmem>>, vector<1x128x128xbf16>
    %148 = vector.shape_cast %147 : vector<1x128x128xbf16> to vector<128x128xbf16>
    %cst_104 = arith.constant dense<0.000000e+00> : vector<16x128xf32>
    %149 = tpu.matmul %138, %148, %cst_104 {dimension_numbers = #tpu.dot_dimension_numbers<[1], [0], [0], [1], [0, 0, 1, 1], [], []>} : vector<16x128xbf16>, vector<128x128xbf16>, vector<16x128xf32> -> vector<16x128xf32>
    %c0_105 = arith.constant 0 : index
    %c1024 = arith.constant 1024 : index
    %150 = vector.load %arg1[%c0_105, %c1024] : memref<1x1920xf32, #tpu.memory_space<vmem>>, vector<1x128xf32>
    %151 = vector.broadcast %150 : vector<1x128xf32> to vector<16x128xf32>
    %152 = arith.addf %149, %151 : vector<16x128xf32>
    %cst_106 = arith.constant 0.000000e+00 : f32
    %153 = vector.broadcast %cst_106 : f32 to vector<16x128xf32>
    %154 = arith.maximumf %152, %153 : vector<16x128xf32>
    %155 = tpu.iota {dimensions = array<i32: 0>} : vector<16x128xi32>
    %c13_i32_107 = arith.constant 13 : i32
    %156 = vector.broadcast %c13_i32_107 : i32 to vector<16x128xi32>
    %157 = arith.cmpi slt, %155, %156 : vector<16x128xi32>
    %158 = arith.extui %157 : vector<16x128xi1> to vector<16x128xi32>
    %159 = arith.sitofp %158 : vector<16x128xi32> to vector<16x128xf32>
    %160 = arith.mulf %154, %159 : vector<16x128xf32>
    %cst_108 = arith.constant dense<0.000000e+00> : vector<128xf32>
    %161 = vector.multi_reduction <add>, %160, %cst_108 [0] : vector<16x128xf32> to vector<128xf32>
    %162 = vector.shape_cast %161 : vector<128xf32> to vector<1x128xf32>
    %cst_109 = arith.constant 0.0769230798 : f32
    %163 = vector.broadcast %cst_109 : f32 to vector<1x128xf32>
    %164 = arith.mulf %162, %163 : vector<1x128xf32>
    %165 = vector.broadcast %164 : vector<1x128xf32> to vector<16x128xf32>
    %166 = arith.subf %154, %165 : vector<16x128xf32>
    %167 = arith.mulf %166, %166 : vector<16x128xf32>
    %168 = arith.mulf %167, %159 : vector<16x128xf32>
    %cst_110 = arith.constant dense<0.000000e+00> : vector<128xf32>
    %169 = vector.multi_reduction <add>, %168, %cst_110 [0] : vector<16x128xf32> to vector<128xf32>
    %170 = vector.shape_cast %169 : vector<128xf32> to vector<1x128xf32>
    %cst_111 = arith.constant 0.0769230798 : f32
    %171 = vector.broadcast %cst_111 : f32 to vector<1x128xf32>
    %172 = arith.mulf %170, %171 : vector<1x128xf32>
    %cst_112 = arith.constant 9.99999974E-6 : f32
    %173 = vector.broadcast %cst_112 : f32 to vector<1x128xf32>
    %174 = arith.addf %172, %173 : vector<1x128xf32>
    %175 = math.rsqrt %174 : vector<1x128xf32>
    %176 = vector.broadcast %164 : vector<1x128xf32> to vector<16x128xf32>
    %177 = arith.subf %154, %176 : vector<16x128xf32>
    %178 = vector.broadcast %175 : vector<1x128xf32> to vector<16x128xf32>
    %179 = arith.mulf %177, %178 : vector<16x128xf32>
    %c0_113 = arith.constant 0 : index
    %c1664 = arith.constant 1664 : index
    %180 = vector.load %arg1[%c0_113, %c1664] : memref<1x1920xf32, #tpu.memory_space<vmem>>, vector<1x128xf32>
    %181 = vector.broadcast %180 : vector<1x128xf32> to vector<16x128xf32>
    %182 = arith.mulf %179, %181 : vector<16x128xf32>
    %c0_114 = arith.constant 0 : index
    %c1792 = arith.constant 1792 : index
    %183 = vector.load %arg1[%c0_114, %c1792] : memref<1x1920xf32, #tpu.memory_space<vmem>>, vector<1x128xf32>
    %184 = vector.broadcast %183 : vector<1x128xf32> to vector<16x128xf32>
    %185 = arith.addf %182, %184 : vector<16x128xf32>
    %186 = arith.truncf %185 : vector<16x128xf32> to vector<16x128xbf16>
    %c0_i32_115 = arith.constant 0 : i32
    %c0_i32_116 = arith.constant 0 : i32
    %c0_i32_117 = arith.constant 0 : i32
    %c0_i32_118 = arith.constant 0 : i32
    %187 = tpu.memref_slice %arg12[%c0_i32_115, %c0_i32_117, %c0_i32_118] : memref<2x256x256xbf16, #tpu.memory_space<vmem>> -> memref<1x128x128xbf16, #tpu.memory_space<vmem>>
    %188 = tpu.memref_squeeze %187 : memref<1x128x128xbf16, #tpu.memory_space<vmem>> -> memref<128x128xbf16, #tpu.memory_space<vmem>>
    %189 = tpu.memref_slice %arg13[%c0_i32_116] : memref<2x!tpu.dma_semaphore, #tpu.memory_space<semaphore_mem>> -> memref<1x!tpu.dma_semaphore, #tpu.memory_space<semaphore_mem>>
    %190 = tpu.memref_squeeze %189 : memref<1x!tpu.dma_semaphore, #tpu.memory_space<semaphore_mem>> -> memref<!tpu.dma_semaphore, #tpu.memory_space<semaphore_mem>>
    tpu.enqueue_dma source(%arg10 : memref<128x128xbf16, #tpu.memory_space<any>>) target(%188 : memref<128x128xbf16, #tpu.memory_space<vmem>>) target_semaphore(%190 : memref<!tpu.dma_semaphore, #tpu.memory_space<semaphore_mem>>)
    %c1_i32_119 = arith.constant 1 : i32
    %c1_i32_120 = arith.constant 1 : i32
    %c0_i32_121 = arith.constant 0 : i32
    %c0_i32_122 = arith.constant 0 : i32
    %191 = tpu.memref_slice %arg12[%c1_i32_119, %c0_i32_121, %c0_i32_122] : memref<2x256x256xbf16, #tpu.memory_space<vmem>> -> memref<1x128x128xbf16, #tpu.memory_space<vmem>>
    %192 = tpu.memref_squeeze %191 : memref<1x128x128xbf16, #tpu.memory_space<vmem>> -> memref<128x128xbf16, #tpu.memory_space<vmem>>
    %193 = tpu.memref_slice %arg13[%c1_i32_120] : memref<2x!tpu.dma_semaphore, #tpu.memory_space<semaphore_mem>> -> memref<1x!tpu.dma_semaphore, #tpu.memory_space<semaphore_mem>>
    %194 = tpu.memref_squeeze %193 : memref<1x!tpu.dma_semaphore, #tpu.memory_space<semaphore_mem>> -> memref<!tpu.dma_semaphore, #tpu.memory_space<semaphore_mem>>
    tpu.wait_dma2 semaphore(%194 : memref<!tpu.dma_semaphore, #tpu.memory_space<semaphore_mem>>) src(%arg9 : memref<128x128xbf16, #tpu.memory_space<any>>) dst(%192 : memref<128x128xbf16, #tpu.memory_space<vmem>>)
    %c1_123 = arith.constant 1 : index
    %c0_124 = arith.constant 0 : index
    %c0_125 = arith.constant 0 : index
    %195 = vector.load %arg12[%c1_123, %c0_124, %c0_125] : memref<2x256x256xbf16, #tpu.memory_space<vmem>>, vector<1x128x128xbf16>
    %196 = vector.shape_cast %195 : vector<1x128x128xbf16> to vector<128x128xbf16>
    %cst_126 = arith.constant dense<0.000000e+00> : vector<16x128xf32>
    %197 = tpu.matmul %186, %196, %cst_126 {dimension_numbers = #tpu.dot_dimension_numbers<[1], [0], [0], [1], [0, 0, 1, 1], [], []>} : vector<16x128xbf16>, vector<128x128xbf16>, vector<16x128xf32> -> vector<16x128xf32>
    %c0_127 = arith.constant 0 : index
    %c1152 = arith.constant 1152 : index
    %198 = vector.load %arg1[%c0_127, %c1152] : memref<1x1920xf32, #tpu.memory_space<vmem>>, vector<1x128xf32>
    %199 = vector.broadcast %198 : vector<1x128xf32> to vector<16x128xf32>
    %200 = arith.addf %197, %199 : vector<16x128xf32>
    %cst_128 = arith.constant 0.000000e+00 : f32
    %201 = vector.broadcast %cst_128 : f32 to vector<16x128xf32>
    %202 = arith.maximumf %200, %201 : vector<16x128xf32>
    %203 = arith.truncf %202 : vector<16x128xf32> to vector<16x128xbf16>
    %c0_i32_129 = arith.constant 0 : i32
    %c0_i32_130 = arith.constant 0 : i32
    %c0_i32_131 = arith.constant 0 : i32
    %c0_i32_132 = arith.constant 0 : i32
    %204 = tpu.memref_slice %arg12[%c0_i32_129, %c0_i32_131, %c0_i32_132] : memref<2x256x256xbf16, #tpu.memory_space<vmem>> -> memref<1x128x128xbf16, #tpu.memory_space<vmem>>
    %205 = tpu.memref_squeeze %204 : memref<1x128x128xbf16, #tpu.memory_space<vmem>> -> memref<128x128xbf16, #tpu.memory_space<vmem>>
    %206 = tpu.memref_slice %arg13[%c0_i32_130] : memref<2x!tpu.dma_semaphore, #tpu.memory_space<semaphore_mem>> -> memref<1x!tpu.dma_semaphore, #tpu.memory_space<semaphore_mem>>
    %207 = tpu.memref_squeeze %206 : memref<1x!tpu.dma_semaphore, #tpu.memory_space<semaphore_mem>> -> memref<!tpu.dma_semaphore, #tpu.memory_space<semaphore_mem>>
    tpu.wait_dma2 semaphore(%207 : memref<!tpu.dma_semaphore, #tpu.memory_space<semaphore_mem>>) src(%arg10 : memref<128x128xbf16, #tpu.memory_space<any>>) dst(%205 : memref<128x128xbf16, #tpu.memory_space<vmem>>)
    %c0_133 = arith.constant 0 : index
    %c0_134 = arith.constant 0 : index
    %c0_135 = arith.constant 0 : index
    %208 = vector.load %arg12[%c0_133, %c0_134, %c0_135] : memref<2x256x256xbf16, #tpu.memory_space<vmem>>, vector<1x128x128xbf16>
    %209 = vector.shape_cast %208 : vector<1x128x128xbf16> to vector<128x128xbf16>
    %cst_136 = arith.constant dense<0.000000e+00> : vector<16x128xf32>
    %210 = tpu.matmul %203, %209, %cst_136 {dimension_numbers = #tpu.dot_dimension_numbers<[1], [0], [0], [1], [0, 0, 1, 1], [], []>} : vector<16x128xbf16>, vector<128x128xbf16>, vector<16x128xf32> -> vector<16x128xf32>
    %c0_137 = arith.constant 0 : index
    %c1280 = arith.constant 1280 : index
    %211 = vector.load %arg1[%c0_137, %c1280] : memref<1x1920xf32, #tpu.memory_space<vmem>>, vector<1x128xf32>
    %212 = vector.broadcast %211 : vector<1x128xf32> to vector<16x128xf32>
    %213 = arith.addf %210, %212 : vector<16x128xf32>
    %214 = arith.negf %213 : vector<16x128xf32>
    %215 = math.exp %214 : vector<16x128xf32>
    %cst_138 = arith.constant 1.000000e+00 : f32
    %216 = vector.broadcast %cst_138 : f32 to vector<16x128xf32>
    %217 = arith.addf %216, %215 : vector<16x128xf32>
    %218 = arith.divf %216, %217 : vector<16x128xf32>
    %c0_139 = arith.constant 0 : index
    %c0_140 = arith.constant 0 : index
    %219 = vector.load %arg11[%c0_139, %c0_140] : memref<16x128xf32, #tpu.memory_space<vmem>>, vector<16x128xf32>
    tpu.vector_store %arg11[%c0_139, %c0_140], %218 {strides = array<i32>} : memref<16x128xf32, #tpu.memory_space<vmem>>, vector<16x128xf32>,
    return
  }
}

</mosaic_0001>

<bundles_post_ra>
// kernel: tpu_custom_call.1
= control target key start
LH: loop header
LB: loop body
LE: loop exit
PB: predicated region body
PF: predicated region fallthrough
CT: control target
= control target key end

     0   :  { %16 = vsyncpa [#allocation5], 0  ;;  %s1810_s0 = inlined_call_operand.hbm [shape: f32[16,128], index: 0, kind: input, shape index: {}]   ;;  %s1811_s1 = inlined_call_operand.hbm [shape: f32[1,1920], index: 1, kind: input, shape index: {}]   ;;  %s1812_s2 = inlined_call_operand.hbm [shape: bf16[128,128], index: 2, kind: input, shape index: {}]   ;;  %s1813_s3 = inlined_call_operand.hbm [shape: bf16[128,128], index: 3, kind: input, shape index: {}]   ;;  %s1814_s4 = inlined_call_operand.hbm [shape: bf16[128,128], index: 4, kind: input, shape index: {}]   ;;  %s1815_s5 = inlined_call_operand.hbm [shape: bf16[128,256], index: 5, kind: input, shape index: {}]   ;;  %s1816_s6 = inlined_call_operand.hbm [shape: bf16[256,256], index: 6, kind: input, shape index: {}]   ;;  %s1817_s7 = inlined_call_operand.hbm [shape: bf16[256,128], index: 7, kind: input, shape index: {}]   ;;  %s1818_s8 = inlined_call_operand.hbm [shape: bf16[128,128], index: 8, kind: input, shape index: {}]   ;;  %s1819_s9 = inlined_call_operand.hbm [shape: bf16[128,128], index: 9, kind: input, shape index: {}]   ;;  %s1820_s10 = inlined_call_operand.hbm [shape: bf16[128,128], index: 10, kind: input, shape index: {}]   ;;  %s1821_s11 = inlined_call_operand.hbm [shape: f32[16,128], index: 11, kind: output, shape index: {}]  }
   0x1   :  { %17 = vsyncpa [#allocation8], 0 }
   0x2   :  { %18 = vsyncpa [#allocation6], 0  ;;  %s1405_s17 = smov [#allocation4]   ;;  %s1161_s21 = scalar_lea.hbm %s1810_s0, 256 }
   0x3   :  { %s24_s18 = sshll.u32 %s1405_s17, 4  ;;  %p1162_p0 = scmp.ne.s32.totalorder %s1810_s0, %s1161_s21  ;;  %s25_s18 = int_to_ptr.vmem [resolvable:$true] %s24_s18 }
   0x4   :  { %p1165_p1 = scmp.lt.u32.totalorder %s1161_s21, %s1810_s0 }
   0x6   :  { %p1167_p2 = pnand %p1165_p1, %p1162_p0 }
   0x8   :  { %1170 = shalt.err (!%p1167_p2)
}
   0x9   :  { %s1171_s26 = scalar_lea.vmem %s25_s18, 256  ;;  %p1176_p4 = scmp.lt.s32.totalorder %s25_s18, %s25_s18 }
   0xa   :  { %p1172_p3 = scmp.ne.s32.totalorder %s25_s18, %s1171_s26  ;;  %p1177_p5 = scmp.lt.s32.totalorder %s1171_s26, %s1171_s26 }
   0xc   :  { %p1178_p6 = por %p1177_p5, %p1176_p4 }
   0xe   :  { %p1179_p7 = pnand %p1178_p6, %p1172_p3 }
  0x10   :  { %1182 = shalt.err (!%p1179_p7)
}
  0x11   :  { %s1406_s27 = smov 128   ;;  %s1407_s28 = smov 8  }
  0x12   :  { %30 = dma.hbm_to_vmem [thread:$0]  %s1810_s0, 256, %s25_s18, [#allocation5], %s1406_s27, %s1406_s27, %s1407_s28  }
  0x13   :  { %s1408_s12 = smov [#allocation7]   ;;  %s1183_s16 = scalar_lea.hbm %s1811_s1, 240 }
  0x14   :  { %s37_s13 = sshll.u32 %s1408_s12, 4  ;;  %p1184_p8 = scmp.ne.s32.totalorder %s1811_s1, %s1183_s16  ;;  %s38_s13 = int_to_ptr.vmem [resolvable:$true] %s37_s13 }
  0x15   :  { %p1187_p9 = scmp.lt.u32.totalorder %s1183_s16, %s1811_s1 }
  0x17   :  { %p1189_p10 = pnand %p1187_p9, %p1184_p8 }
  0x19   :  { %1192 = shalt.err (!%p1189_p10)
}
  0x1a   :  { %s1193_s22 = scalar_lea.vmem %s38_s13, 240  ;;  %s1197_s0 = scalar_lea.vmem %s38_s13, 256 }
  0x1b   :  { %p1194_p11 = scmp.ne.s32.totalorder %s38_s13, %s1193_s22  ;;  %p1198_p12 = scmp.lt.s32.totalorder %s38_s13, %s38_s13 }
  0x1c   :  { %p1199_p13 = scmp.lt.s32.totalorder %s1197_s0, %s1193_s22 }
  0x1e   :  { %p1200_p0 = por %p1199_p13, %p1198_p12 }
  0x20   :  { %p1201_p1 = pnand %p1200_p0, %p1194_p11 }
  0x22   :  { %1204 = shalt.err (!%p1201_p1)
}
  0x23   :  { %40 = dma.hbm_to_vmem [thread:$0]  %s1811_s1, 240, %s38_s13, [#allocation8]  }
  0x24   :  { %1381 = dma.done.wait [#allocation5], 256  }
  0x25   :  { %1382 = vsyncadd [#allocation5], 4294967040 }
  0x26   :  { %1383 = dma.done.wait [#allocation8], 240  }
  0x27   :  { %1384 = vsyncadd [#allocation8], 4294967056  ;;  %s1409_s24 = smov [#allocation2]   ;;  %s1410_s26 = smov [#allocation2 + $0x100]  }
  0x28   :  { %s49_s25 = sshll.u32 %s1409_s24, 4  ;;  %s59_s29 = sshll.u32 %s1410_s26, 4  ;;  %s1510_s25 = int_to_ptr.vmem [resolvable:$true] %s49_s25  ;;  %s1542_s29 = int_to_ptr.vmem [resolvable:$true] %s59_s29 }
  0x29   :  { %s1205_s14 = scalar_lea.hbm %s1812_s2, 1024 }
  0x2a   :  { %p1206_p2 = scmp.ne.s32.totalorder %s1812_s2, %s1205_s14  ;;  %p1209_p3 = scmp.lt.u32.totalorder %s1205_s14, %s1812_s2 }
  0x2c   :  { %p1211_p4 = pnand %p1209_p3, %p1206_p2 }
  0x2e   :  { %1214 = shalt.err (!%p1211_p4)  }
  0x2f   :  { %s1215_s13 = scalar_lea.vmem %s1510_s25, 1024  ;;  %s1524_s19 = scalar_lea.vmem %s1510_s25, 8192 }
  0x30   :  { %p1216_p5 = scmp.ne.s32.totalorder %s1510_s25, %s1215_s13  ;;  %p1220_p6 = scmp.lt.s32.totalorder %s1510_s25, %s1510_s25 }
  0x31   :  { %p1221_p7 = scmp.lt.s32.totalorder %s1524_s19, %s1215_s13 }
  0x33   :  { %p1222_p8 = por %p1221_p7, %p1220_p6 }
  0x35   :  { %p1529_p9 = pnand %p1222_p8, %p1216_p5 }
  0x37   :  { %1226 = shalt.err (!%p1529_p9)  }
  0x38   :  { %s1411_s21 = smov 256   ;;  %s1227_s24 = scalar_lea.hbm %s1813_s3, 1024 }
  0x39   :  { %52 = dma.hbm_to_vmem [thread:$0]  %s1812_s2, 1024, %s1510_s25, [#allocation3], %s1406_s27, %s1411_s21, %s1407_s28 }
  0x3a   :  { %p1228_p10 = scmp.ne.s32.totalorder %s1813_s3, %s1227_s24  ;;  %p1231_p11 = scmp.lt.u32.totalorder %s1227_s24, %s1813_s3 }
  0x3c   :  { %p1233_p12 = pnand %p1231_p11, %p1228_p10 }
  0x3e   :  { %1236 = shalt.err (!%p1233_p12)  }
  0x3f   :  { %s1237_s2 = scalar_lea.vmem %s1542_s29, 1024  ;;  %p1242_p0 = scmp.lt.s32.totalorder %s1542_s29, %s1510_s25 }
  0x40   :  { %p1555_p13 = scmp.ne.s32.totalorder %s1542_s29, %s1237_s2  ;;  %p1243_p1 = scmp.lt.s32.totalorder %s1524_s19, %s1237_s2 }
  0x42   :  { %p1565_p2 = por %p1243_p1, %p1242_p0 }
  0x44   :  { %p1245_p3 = pnand %p1565_p2, %p1555_p13 }
  0x46   :  { %1248 = shalt.err (!%p1245_p3)  }
  0x47   :  { %62 = dma.hbm_to_vmem [thread:$0]  %s1813_s3, 1024, %s1542_s29, [#allocation3 + $0x1], %s1406_s27, %s1411_s21, %s1407_s28  ;;  %v53_v0 = vld [vmem:[#allocation4] sm:$0xff]  ;;  %v54_v1 = vld [vmem:[#allocation4 + $0x8] sm:$0xff] }
  0x48   :  { %v55_v2 = vpack.c.bf16 %v54_v1, %v53_v0 }
  0x49   :  { %1385 = dma.done.wait [#allocation3], 1024 }
  0x4a   :  { %1386 = vsyncadd [#allocation3], 4294966272  ;;  %v1412_v3 = vmov 0.0   ;;  %vm1413_vm0 = vmmov 0   ;;  %v67_v4 = vld [vmem:[#allocation2] sm:$0xff]  ;;  %v68_v5 = vld [vmem:[#allocation2 + $0x10] sm:$0xff] }
  0x4b   :  { %1011 = vmatprep.subr.bf16.mxu0 %v1412_v3  ;;  %1027 = vmatprep.mubr.msk.bf16.mxu0 %vm1413_vm0, %v1412_v3  ;;  %v69_v6 = vld [vmem:[#allocation2 + $0x20] sm:$0xff]  ;;  %v70_v7 = vld [vmem:[#allocation2 + $0x30] sm:$0xff]  ;;  %s1249_s22 = scalar_lea.hbm %s1814_s4, 1024 }
  0x4c   :  { %1012 = vmatpush3.bf16.msra.mxu0 %v67_v4  ;;  %v71_v8 = vld [vmem:[#allocation2 + $0x40] sm:$0xff]  ;;  %v72_v9 = vld [vmem:[#allocation2 + $0x50] sm:$0xff]  ;;  %p1250_p4 = scmp.ne.s32.totalorder %s1814_s4, %s1249_s22  ;;  %p1253_p5 = scmp.lt.u32.totalorder %s1249_s22, %s1814_s4 }
  0x4d   :  { %1013 = vmatprep.subr.bf16.mxu0 %v1412_v3  ;;  %v73_v10 = vld [vmem:[#allocation2 + $0x60] sm:$0xff]  ;;  %v74_v11 = vld [vmem:[#allocation2 + $0x70] sm:$0xff] }
  0x4e   :  { %p1255_p6 = pnand %p1253_p5, %p1250_p4 }
  0x50   :  { %1258 = shalt.err (!%p1255_p6)  }
  0x51   :  { %1270 = shalt.err (!%p1529_p9)  }
  0x52   :  { %130 = dma.hbm_to_vmem [thread:$0]  %s1814_s4, 1024, %s1510_s25, [#allocation3], %s1406_s27, %s1411_s21, %s1407_s28  ;;  %1014 = vmatpush3.bf16.msra.mxu0 %v68_v5  ;;  %v915_v12 = vld [vmem:[#allocation7] ss:$0 sm:$0xff] }
  0x53   :  { %1015 = vmatprep.subr.bf16.mxu0 %v1412_v3 }
  0x56   :  { %1016 = vmatpush3.bf16.msra.mxu0 %v69_v6 }
  0x57   :  { %1017 = vmatprep.subr.bf16.mxu0 %v1412_v3 }
  0x5a   :  { %1018 = vmatpush3.bf16.msra.mxu0 %v70_v7 }
  0x5b   :  { %1019 = vmatprep.subr.bf16.mxu0 %v1412_v3 }
  0x5e   :  { %1020 = vmatpush3.bf16.msra.mxu0 %v71_v8 }
  0x5f   :  { %1021 = vmatprep.subr.bf16.mxu0 %v1412_v3 }
  0x62   :  { %1022 = vmatpush3.bf16.msra.mxu0 %v72_v9 }
  0x63   :  { %1023 = vmatprep.subr.bf16.mxu0 %v1412_v3 }
  0x66   :  { %1024 = vmatpush3.bf16.msra.mxu0 %v73_v10 }
  0x67   :  { %1025 = vmatprep.subr.bf16.mxu0 %v1412_v3 }
  0x6a   :  { %1026 = vmatpush3.bf16.msra.mxu0 %v74_v11 }
  0x6d   :  { %1028 = vmatmul.mubr.bf16.vlgmr.msra.gmra.mrb[0].mxu0 %v55_v2 }
 0x140   :  { %v116_v13 = vpop.f32.mrb[0].mxu0 }
 0x141   :  { %v117_v14 = vadd.f32 %v915_v12, %v116_v13  ;;  %v1029_v15 = vpop.f32.mrb[1].mxu0 }
 0x142   :  { %v119_v16 = vpop.f32.mrb[2].mxu0 }
 0x143   :  { %v120_v17 = vadd.f32 %v915_v12, %v119_v16  ;;  %v1030_v18 = vpop.f32.mrb[3].mxu0  ;;  %v123_v19 = vmax.f32 %v117_v14, 0.0 }
 0x145   :  { %v124_v20 = vmax.f32 %v120_v17, 0.0 }
 0x147   :  { %v125_v21 = vpack.c.bf16 %v124_v20, %v123_v19 }
 0x148   :  { %1387 = dma.done.wait [#allocation3 + $0x1], 1024 }
 0x149   :  { %1388 = vsyncadd [#allocation3 + $0x1], 4294966272  ;;  %1031 = vmatprep.subr.bf16.mxu1 %v1412_v3  ;;  %1047 = vmatprep.mubr.msk.bf16.mxu1 %vm1413_vm0, %v1412_v3  ;;  %263 = sst [smem:[#allocation14]] %s1411_s21  ;;  %s1414_s4 = smov 2   ;;  %v133_v22 = vld [vmem:[#allocation2 + $0x100] sm:$0xff]  ;;  %v134_v23 = vld [vmem:[#allocation2 + $0x110] sm:$0xff]  ;;  %v191_v33 = vlaneseq }
 0x14a   :  { %265 = sst [smem:[#allocation14 + $0x1]] %s1411_s21  ;;  %s1415_s12 = smov 64   ;;  %1032 = vmatpush3.bf16.msra.mxu1 %v133_v22  ;;  %v135_v24 = vld [vmem:[#allocation2 + $0x120] sm:$0xff]  ;;  %v136_v25 = vld [vmem:[#allocation2 + $0x130] sm:$0xff]  ;;  %v918_v31 = vld [vmem:[#allocation7 + $0xb] ss:$0 sm:$0xff] }
 0x14b   :  { %267 = sst [smem:[#allocation14 + $0x2]] %s1414_s4  ;;  %s1416_s14 = smov 4   ;;  %1033 = vmatprep.subr.bf16.mxu1 %v1412_v3  ;;  %v137_v26 = vld [vmem:[#allocation2 + $0x140] sm:$0xff]  ;;  %v138_v27 = vld [vmem:[#allocation2 + $0x150] sm:$0xff]  ;;  %v919_v32 = vld [vmem:[#allocation7 + $0xc] ss:$0 sm:$0xff] }
 0x14c   :  { %269 = sst [smem:[#allocation14 + $0x3]] %s1415_s12  ;;  %v139_v28 = vld [vmem:[#allocation2 + $0x160] sm:$0xff]  ;;  %v140_v29 = vld [vmem:[#allocation2 + $0x170] sm:$0xff]  ;;  %s251_s2 = sld [smem:[#allocation0]]   ;;  %v1639_v34 = vshrl.u32 %v191_v33, 7 }
 0x14d   :  { %271 = sst [smem:[#allocation14 + $0x4]] %s1406_s27  ;;  %v916_v30 = vld [vmem:[#allocation7 + $0x1] ss:$0 sm:$0xff]  ;;  %s1417_s3 = smov [#allocation3 + $0x1]  }
 0x14e   :  { %273 = sst [smem:[#allocation14 + $0x5]] %s1414_s4  ;;  %1034 = vmatpush3.bf16.msra.mxu1 %v134_v23  ;;  %s1418_s13 = smov [#allocation13]   ;;  %v193_v35 = vadd.s32 8, %v1639_v34 }
 0x14f   :  { %275 = sst [smem:[#allocation14 + $0x6]] %s1406_s27  ;;  %1035 = vmatprep.subr.bf16.mxu1 %v1412_v3 }
 0x150   :  { %277 = sst [smem:[#allocation14 + $0x7]] %s1415_s12  ;;  %vm195_vm1 = vcmp.lt.s32.totalorder %v193_v35, 13 }
 0x151   :  { %279 = sst [smem:[#allocation14 + $0x8]] %s1416_s14  ;;  %v1643_v42 = vsel %vm195_vm1, 1.0, %v1412_v3 }
 0x152   :  { %1036 = vmatpush3.bf16.msra.mxu1 %v135_v24  ;;  %s920_s17 = sshll.u32 %s251_s2, 26 }
 0x153   :  { %1037 = vmatprep.subr.bf16.mxu1 %v1412_v3  ;;  %s1632_s1 = sadd.s32 134217728, %s920_s17 }
 0x154   :  { %281 = dma.general %s1815_s5, 2048, %s1542_s29, %s1417_s3, %s1418_s13, [#allocation14], %s1632_s1, 0  }
 0x156   :  { %1038 = vmatpush3.bf16.msra.mxu1 %v136_v25 }
 0x157   :  { %1039 = vmatprep.subr.bf16.mxu1 %v1412_v3 }
 0x15a   :  { %1040 = vmatpush3.bf16.msra.mxu1 %v137_v26 }
 0x15b   :  { %1041 = vmatprep.subr.bf16.mxu1 %v1412_v3 }
 0x15e   :  { %1042 = vmatpush3.bf16.msra.mxu1 %v138_v27 }
 0x15f   :  { %1043 = vmatprep.subr.bf16.mxu1 %v1412_v3 }
 0x162   :  { %1044 = vmatpush3.bf16.msra.mxu1 %v139_v28 }
 0x163   :  { %1045 = vmatprep.subr.bf16.mxu1 %v1412_v3 }
 0x166   :  { %1046 = vmatpush3.bf16.msra.mxu1 %v140_v29 }
 0x169   :  { %1048 = vmatmul.mubr.bf16.vlgmr.msra.gmra.mrb[0].mxu1 %v125_v21 }
 0x23c   :  { %v182_v36 = vpop.f32.mrb[0].mxu1 }
 0x23d   :  { %v1049_v37 = vpop.f32.mrb[1].mxu1  ;;  %v183_v39 = vadd.f32 %v916_v30, %v182_v36 }
 0x23e   :  { %v185_v38 = vpop.f32.mrb[2].mxu1 }
 0x23f   :  { %v186_v40 = vadd.f32 %v916_v30, %v185_v38  ;;  %v1050_v41 = vpop.f32.mrb[3].mxu1  ;;  %v189_v44 = vmax.f32 %v183_v39, 0.0 }
 0x241   :  { %v190_v43 = vmax.f32 %v186_v40, 0.0 }
 0x243   :  { %v201_v45 = vmul.f32 %v1643_v42, %v190_v43 }
 0x245   :  { %v202_v46 = vadd.f32 %v201_v45, %v189_v44 }
 0x247   :  { %v203_v47 = vrot.slane %v202_v46, 4 }
 0x249   :  { %v204_v48 = vadd.f32 %v203_v47, %v202_v46 }
 0x24b   :  { %v205_v49 = vrot.slane %v204_v48, 2 }
 0x24d   :  { %v206_v50 = vadd.f32 %v205_v49, %v204_v48 }
 0x24f   :  { %v207_v51 = vrot.slane %v206_v50, 1 }
 0x251   :  { %v208_v52 = vadd.f32 %v207_v51, %v206_v50 }
 0x253   :  { %v209_v53 = vmul.f32 0.07692308, %v208_v52 }
 0x255   :  { %v210_v54 = vsub.f32 %v189_v44, %v209_v53  ;;  %v211_v55 = vsub.f32 %v190_v43, %v209_v53 }
 0x257   :  { %v213_v56 = vmul.f32 %v211_v55, %v211_v55  ;;  %v212_v57 = vmul.f32 %v210_v54, %v210_v54 }
 0x259   :  { %v215_v58 = vmul.f32 %v1643_v42, %v213_v56 }
 0x25b   :  { %v216_v59 = vadd.f32 %v215_v58, %v212_v57 }
 0x25d   :  { %v217_v60 = vrot.slane %v216_v59, 4 }
 0x25f   :  { %v218_v61 = vadd.f32 %v217_v60, %v216_v59 }
 0x261   :  { %v219_v62 = vrot.slane %v218_v61, 2 }
 0x263   :  { %v220_v63 = vadd.f32 %v219_v62, %v218_v61 }
 0x265   :  { %v221_v0 = vrot.slane %v220_v63, 1 }
 0x267   :  { %v222_v1 = vadd.f32 %v221_v0, %v220_v63 }
 0x269   :  { %v223_v2 = vmul.f32 0.07692308, %v222_v1 }
 0x26b   :  { %v224_v4 = vadd.f32 1e-05, %v223_v2 }
 0x26d   :  { %1149 = vrsqrt.f32 %v224_v4 }
 0x277   :  { %v1150_v5 = vpop.eup %1149 }
 0x278   :  { %v226_v6 = vmul.f32 %v1150_v5, %v210_v54  ;;  %v227_v7 = vmul.f32 %v1150_v5, %v211_v55 }
 0x27a   :  { %v235_v8 = vmul.f32 %v918_v31, %v226_v6  ;;  %v236_v9 = vmul.f32 %v918_v31, %v227_v7 }
 0x27c   :  { %v244_v10 = vadd.f32 %v919_v32, %v235_v8  ;;  %v245_v11 = vadd.f32 %v919_v32, %v236_v9 }
 0x27e   :  { %v246_v12 = vpack.c.bf16 %v245_v11, %v244_v10 }
 0x27f   :  { %1389 = dma.done.wait [#allocation3], 1024 }
 0x280   :  { %1390 = vsyncadd [#allocation3], 4294966272  ;;  %1051 = vmatprep.subr.bf16.mxu0 %v1412_v3  ;;  %1067 = vmatprep.mubr.msk.bf16.mxu0 %vm1413_vm0, %v1412_v3  ;;  %358 = sst [smem:[#allocation16]] %s1411_s21  ;;  %v284_v13 = vld [vmem:[#allocation2] sm:$0xff]  ;;  %v285_v14 = vld [vmem:[#allocation2 + $0x10] sm:$0xff]  ;;  %s1419_s5 = smov [#allocation3]  }
 0x281   :  { %360 = sst [smem:[#allocation16 + $0x1]] %s1411_s21  ;;  %1052 = vmatpush3.bf16.msra.mxu0 %v284_v13  ;;  %v286_v15 = vld [vmem:[#allocation2 + $0x20] sm:$0xff]  ;;  %v287_v16 = vld [vmem:[#allocation2 + $0x30] sm:$0xff]  ;;  %s1420_s18 = smov [#allocation15]  }
 0x282   :  { %362 = sst [smem:[#allocation16 + $0x2]] %s1414_s4  ;;  %1053 = vmatprep.subr.bf16.mxu0 %v1412_v3  ;;  %v288_v17 = vld [vmem:[#allocation2 + $0x40] sm:$0xff]  ;;  %v289_v18 = vld [vmem:[#allocation2 + $0x50] sm:$0xff] }
 0x283   :  { %364 = sst [smem:[#allocation16 + $0x3]] %s1415_s12  ;;  %v290_v19 = vld [vmem:[#allocation2 + $0x60] sm:$0xff]  ;;  %v291_v20 = vld [vmem:[#allocation2 + $0x70] sm:$0xff] }
 0x284   :  { %366 = sst [smem:[#allocation16 + $0x4]] %s1406_s27  ;;  %v922_v21 = vld [vmem:[#allocation7 + $0x2] ss:$0 sm:$0xff] }
 0x285   :  { %368 = sst [smem:[#allocation16 + $0x5]] %s1414_s4  ;;  %1054 = vmatpush3.bf16.msra.mxu0 %v285_v14 }
 0x286   :  { %370 = sst [smem:[#allocation16 + $0x6]] %s1406_s27  ;;  %1055 = vmatprep.subr.bf16.mxu0 %v1412_v3 }
 0x287   :  { %372 = sst [smem:[#allocation16 + $0x7]] %s1415_s12 }
 0x288   :  { %374 = sst [smem:[#allocation16 + $0x8]] %s1416_s14 }
 0x289   :  { %1056 = vmatpush3.bf16.msra.mxu0 %v286_v15  ;;  %376 = dma.general %s1816_s6, 4096, %s1510_s25, %s1419_s5, %s1420_s18, [#allocation16], %s1632_s1, 0  }
 0x28a   :  { %1057 = vmatprep.subr.bf16.mxu0 %v1412_v3 }
 0x28d   :  { %1058 = vmatpush3.bf16.msra.mxu0 %v287_v16 }
 0x28e   :  { %1059 = vmatprep.subr.bf16.mxu0 %v1412_v3 }
 0x291   :  { %1060 = vmatpush3.bf16.msra.mxu0 %v288_v17 }
 0x292   :  { %1061 = vmatprep.subr.bf16.mxu0 %v1412_v3 }
 0x295   :  { %1062 = vmatpush3.bf16.msra.mxu0 %v289_v18 }
 0x296   :  { %1063 = vmatprep.subr.bf16.mxu0 %v1412_v3 }
 0x299   :  { %1064 = vmatpush3.bf16.msra.mxu0 %v290_v19 }
 0x29a   :  { %1065 = vmatprep.subr.bf16.mxu0 %v1412_v3 }
 0x29d   :  { %1066 = vmatpush3.bf16.msra.mxu0 %v291_v20 }
 0x2a0   :  { %1068 = vmatmul.mubr.bf16.vlgmr.msra.gmra.mrb[4].mxu0 %v246_v12 }
 0x373   :  { %v333_v22 = vpop.f32.mrb[4].mxu0 }
 0x374   :  { %v334_v23 = vadd.f32 %v922_v21, %v333_v22  ;;  %v1069_v24 = vpop.f32.mrb[5].mxu0 }
 0x375   :  { %v336_v25 = vpop.f32.mrb[6].mxu0 }
 0x376   :  { %v337_v26 = vadd.f32 %v922_v21, %v336_v25  ;;  %v1070_v27 = vpop.f32.mrb[7].mxu0  ;;  %v340_v28 = vmax.f32 %v334_v23, 0.0 }
 0x378   :  { %v341_v29 = vmax.f32 %v337_v26, 0.0 }
 0x37a   :  { %v342_v30 = vpack.c.bf16 %v341_v29, %v340_v28 }
 0x37b   :  { %1391 = dma.done.wait [#allocation3 + $0x1], 2048 }
 0x37c   :  { %1392 = vsyncadd [#allocation3 + $0x1], 4294965248  ;;  %v1421_v31 = vmov 0   ;;  %v381_v32 = vld [vmem:[#allocation2 + $0x108] sm:$0xff]  ;;  %v380_v33 = vld [vmem:[#allocation2 + $0x100] sm:$0xff]  ;;  %s1271_s30 = scalar_lea.hbm %s1817_s7, 2048 }
 0x37d   :  { %440 = vmatprep.mubr.bf16.mxu1 %v1421_v31  ;;  %v383_v35 = vld [vmem:[#allocation2 + $0x118] sm:$0xff]  ;;  %408 = vmatprep.subr.bf16.mxu1 %v381_v32  ;;  %v382_v36 = vld [vmem:[#allocation2 + $0x110] sm:$0xff]  ;;  %v385_v37 = vld [vmem:[#allocation2 + $0x128] sm:$0xff]  ;;  %p1272_p7 = scmp.ne.s32.totalorder %s1817_s7, %s1271_s30  ;;  %p1275_p8 = scmp.lt.u32.totalorder %s1271_s30, %s1817_s7 }
 0x37e   :  { %409 = vmatpush1.bf16.msra.mxu1 %v380_v33  ;;  %v384_v38 = vld [vmem:[#allocation2 + $0x120] sm:$0xff]  ;;  %v387_v39 = vld [vmem:[#allocation2 + $0x138] sm:$0xff]  ;;  %v386_v40 = vld [vmem:[#allocation2 + $0x130] sm:$0xff] }
 0x37f   :  { %410 = vmatprep.subr.bf16.mxu1 %v383_v35  ;;  %v389_v41 = vld [vmem:[#allocation2 + $0x148] sm:$0xff]  ;;  %v388_v43 = vld [vmem:[#allocation2 + $0x140] sm:$0xff]  ;;  %v391_v44 = vld [vmem:[#allocation2 + $0x158] sm:$0xff]  ;;  %p1277_p10 = pnand %p1275_p8, %p1272_p7 }
 0x380   :  { %v390_v45 = vld [vmem:[#allocation2 + $0x150] sm:$0xff]  ;;  %v393_v46 = vld [vmem:[#allocation2 + $0x168] sm:$0xff]  ;;  %v392_v47 = vld [vmem:[#allocation2 + $0x160] sm:$0xff] }
 0x381   :  { %v395_v48 = vld [vmem:[#allocation2 + $0x178] sm:$0xff]  ;;  %v394_v49 = vld [vmem:[#allocation2 + $0x170] sm:$0xff] }
 0x382   :  { %411 = vmatpush1.bf16.msra.mxu1 %v382_v36 }
 0x383   :  { %1280 = shalt.err (!%p1277_p10)  }
 0x384   :  { %s1281_s17 = scalar_lea.vmem %s1542_s29, 2048 }
 0x385   :  { %p1282_p11 = scmp.ne.s32.totalorder %s1542_s29, %s1281_s17  ;;  %p1287_p12 = scmp.lt.s32.totalorder %s1524_s19, %s1281_s17 }
 0x387   :  { %p1288_p1 = por %p1287_p12, %p1242_p0 }
 0x389   :  { %p1289_p4 = pnand %p1288_p1, %p1282_p11 }
 0x38b   :  { %1292 = shalt.err (!%p1289_p4)  }
 0x38c   :  { %461 = dma.hbm_to_vmem [thread:$0]  %s1817_s7, 2048, %s1542_s29, [#allocation3 + $0x1], %s1406_s27, %s1411_s21, %s1407_s28  ;;  %412 = vmatprep.subr.bf16.mxu1 %v385_v37  ;;  %v400_v50 = vsub.s32 0, %v1639_v34  ;;  %v396_v51 = vld [vmem:[#allocation7 + $0x3] sm:$0x3]  ;;  %v404_v52 = vsub.s32 1, %v1639_v34 }
 0x38d   :  { %413 = vmatpush1.bf16.msra.mxu1 %v384_v38 }
 0x38e   :  { %414 = vmatprep.subr.bf16.mxu1 %v387_v39  ;;  %v401_v53 = vrot.slane %v396_v51, %v400_v50  ;;  %v405_v54 = vrot.slane %v396_v51, %v404_v52 }
 0x391   :  { %415 = vmatpush1.bf16.msra.mxu1 %v386_v40 }
 0x392   :  { %416 = vmatprep.subr.bf16.mxu1 %v389_v41 }
 0x395   :  { %417 = vmatpush1.bf16.msra.mxu1 %v388_v43 }
 0x396   :  { %418 = vmatprep.subr.bf16.mxu1 %v391_v44 }
 0x399   :  { %419 = vmatpush1.bf16.msra.mxu1 %v390_v45 }
 0x39a   :  { %420 = vmatprep.subr.bf16.mxu1 %v393_v46 }
 0x39d   :  { %421 = vmatpush1.bf16.msra.mxu1 %v392_v47 }
 0x39e   :  { %422 = vmatprep.subr.bf16.mxu1 %v395_v48 }
 0x3a1   :  { %423 = vmatpush1.bf16.msra.mxu1 %v394_v49 }
 0x3a4   :  { %441 = vmatmul.mubr.bf16.vlgmr.msra.gmra.mrb[4].mxu1 %v342_v30 }
 0x477   :  { %v442_v55 = vpop.f32.mrb[4].mxu1 }
 0x478   :  { %v443_v56 = vadd.f32 %v442_v55, %v401_v53  ;;  %v444_v57 = vpop.f32.mrb[5].mxu1 }
 0x479   :  { %v445_v58 = vadd.f32 %v444_v57, %v405_v54  ;;  %v446_v59 = vpop.f32.mrb[6].mxu1 }
 0x47a   :  { %v447_v60 = vadd.f32 %v446_v59, %v401_v53  ;;  %v448_v61 = vpop.f32.mrb[7].mxu1  ;;  %v451_v63 = vmax.f32 %v443_v56, 0.0 }
 0x47b   :  { %v449_v62 = vadd.f32 %v448_v61, %v405_v54  ;;  %v452_v1 = vmax.f32 %v445_v58, 0.0 }
 0x47c   :  { %v453_v0 = vmax.f32 %v447_v60, 0.0 }
 0x47d   :  { %v454_v2 = vmax.f32 %v449_v62, 0.0 }
 0x47e   :  { %v1699_v4 = vpack.c.bf16 %v453_v0, %v451_v63 }
 0x47f   :  { %v456_v5 = vpack.c.bf16 %v454_v2, %v452_v1 }
 0x480   :  { %1393 = dma.done.wait [#allocation3], 4096 }
 0x481   :  { %1394 = vsyncadd [#allocation3], 4294963200  ;;  %542 = vmatprep.mubr.bf16.mxu0 %v456_v5  ;;  %v467_v6 = vld [vmem:[#allocation2 + $0x8] sm:$0xff]  ;;  %v466_v7 = vld [vmem:[#allocation2] sm:$0xff]  ;;  %s1293_s13 = scalar_lea.hbm %s1818_s8, 1024 }
 0x482   :  { %v469_v8 = vld [vmem:[#allocation2 + $0x18] sm:$0xff]  ;;  %510 = vmatprep.subr.bf16.mxu0 %v467_v6  ;;  %v468_v9 = vld [vmem:[#allocation2 + $0x10] sm:$0xff]  ;;  %v471_v10 = vld [vmem:[#allocation2 + $0x28] sm:$0xff]  ;;  %p1294_p0 = scmp.ne.s32.totalorder %s1818_s8, %s1293_s13  ;;  %p1297_p5 = scmp.lt.u32.totalorder %s1293_s13, %s1818_s8 }
 0x483   :  { %511 = vmatpush1.bf16.msra.mxu0 %v466_v7  ;;  %v470_v11 = vld [vmem:[#allocation2 + $0x20] sm:$0xff]  ;;  %v473_v12 = vld [vmem:[#allocation2 + $0x38] sm:$0xff]  ;;  %v472_v13 = vld [vmem:[#allocation2 + $0x30] sm:$0xff] }
 0x484   :  { %512 = vmatprep.subr.bf16.mxu0 %v469_v8  ;;  %v475_v14 = vld [vmem:[#allocation2 + $0x48] sm:$0xff]  ;;  %v474_v15 = vld [vmem:[#allocation2 + $0x40] sm:$0xff]  ;;  %v477_v16 = vld [vmem:[#allocation2 + $0x58] sm:$0xff]  ;;  %p1299_p6 = pnand %p1297_p5, %p1294_p0 }
 0x485   :  { %v476_v17 = vld [vmem:[#allocation2 + $0x50] sm:$0xff]  ;;  %v479_v18 = vld [vmem:[#allocation2 + $0x68] sm:$0xff]  ;;  %v478_v19 = vld [vmem:[#allocation2 + $0x60] sm:$0xff] }
 0x486   :  { %v481_v20 = vld [vmem:[#allocation2 + $0x78] sm:$0xff]  ;;  %v480_v21 = vld [vmem:[#allocation2 + $0x70] sm:$0xff]  ;;  %v483_v22 = vld [vmem:[#allocation2 + $0x88] sm:$0xff] }
 0x487   :  { %513 = vmatpush1.bf16.msra.mxu0 %v468_v9  ;;  %v482_v23 = vld [vmem:[#allocation2 + $0x80] sm:$0xff]  ;;  %v485_v24 = vld [vmem:[#allocation2 + $0x98] sm:$0xff]  ;;  %v484_v25 = vld [vmem:[#allocation2 + $0x90] sm:$0xff] }
 0x488   :  { %514 = vmatprep.subr.bf16.mxu0 %v471_v10  ;;  %v487_v26 = vld [vmem:[#allocation2 + $0xa8] sm:$0xff]  ;;  %v486_v27 = vld [vmem:[#allocation2 + $0xa0] sm:$0xff]  ;;  %v489_v28 = vld [vmem:[#allocation2 + $0xb8] sm:$0xff] }
 0x489   :  { %v488_v29 = vld [vmem:[#allocation2 + $0xb0] sm:$0xff]  ;;  %v491_v30 = vld [vmem:[#allocation2 + $0xc8] sm:$0xff]  ;;  %v490_v31 = vld [vmem:[#allocation2 + $0xc0] sm:$0xff] }
 0x48a   :  { %v493_v32 = vld [vmem:[#allocation2 + $0xd8] sm:$0xff]  ;;  %v492_v33 = vld [vmem:[#allocation2 + $0xd0] sm:$0xff]  ;;  %v495_v35 = vld [vmem:[#allocation2 + $0xe8] sm:$0xff] }
 0x48b   :  { %515 = vmatpush1.bf16.msra.mxu0 %v470_v11  ;;  %v494_v36 = vld [vmem:[#allocation2 + $0xe0] sm:$0xff]  ;;  %v497_v37 = vld [vmem:[#allocation2 + $0xf8] sm:$0xff]  ;;  %v496_v38 = vld [vmem:[#allocation2 + $0xf0] sm:$0xff] }
 0x48c   :  { %516 = vmatprep.subr.bf16.mxu0 %v473_v12 }
 0x48d   :  { %1302 = shalt.err (!%p1299_p6)  }
 0x48e   :  { %1314 = shalt.err (!%p1529_p9)  }
 0x48f   :  { %563 = dma.hbm_to_vmem [thread:$0]  %s1818_s8, 1024, %s1510_s25, [#allocation3], %s1406_s27, %s1411_s21, %s1407_s28  ;;  %517 = vmatpush1.bf16.msra.mxu0 %v472_v13  ;;  %v498_v39 = vld [vmem:[#allocation7 + $0x5] sm:$0x3] }
 0x490   :  { %518 = vmatprep.subr.bf16.mxu0 %v475_v14  ;;  %v503_v40 = vrot.slane %v498_v39, %v400_v50  ;;  %v507_v41 = vrot.slane %v498_v39, %v404_v52 }
 0x493   :  { %519 = vmatpush1.bf16.msra.mxu0 %v474_v15 }
 0x494   :  { %520 = vmatprep.subr.bf16.mxu0 %v477_v16 }
 0x497   :  { %521 = vmatpush1.bf16.msra.mxu0 %v476_v17 }
 0x498   :  { %522 = vmatprep.subr.bf16.mxu0 %v479_v18 }
 0x49b   :  { %523 = vmatpush1.bf16.msra.mxu0 %v478_v19 }
 0x49c   :  { %524 = vmatprep.subr.bf16.mxu0 %v481_v20 }
 0x49f   :  { %525 = vmatpush1.bf16.msra.mxu0 %v480_v21 }
 0x4a0   :  { %526 = vmatprep.subr.bf16.mxu0 %v483_v22 }
 0x4a3   :  { %527 = vmatpush1.bf16.msra.mxu0 %v482_v23 }
 0x4a4   :  { %528 = vmatprep.subr.bf16.mxu0 %v485_v24 }
 0x4a7   :  { %529 = vmatpush1.bf16.msra.mxu0 %v484_v25 }
 0x4a8   :  { %530 = vmatprep.subr.bf16.mxu0 %v487_v26 }
 0x4ab   :  { %531 = vmatpush1.bf16.msra.mxu0 %v486_v27 }
 0x4ac   :  { %532 = vmatprep.subr.bf16.mxu0 %v489_v28 }
 0x4af   :  { %533 = vmatpush1.bf16.msra.mxu0 %v488_v29 }
 0x4b0   :  { %534 = vmatprep.subr.bf16.mxu0 %v491_v30 }
 0x4b3   :  { %535 = vmatpush1.bf16.msra.mxu0 %v490_v31 }
 0x4b4   :  { %536 = vmatprep.subr.bf16.mxu0 %v493_v32 }
 0x4b7   :  { %537 = vmatpush1.bf16.msra.mxu0 %v492_v33 }
 0x4b8   :  { %538 = vmatprep.subr.bf16.mxu0 %v495_v35 }
 0x4bb   :  { %539 = vmatpush1.bf16.msra.mxu0 %v494_v36 }
 0x4bc   :  { %540 = vmatprep.subr.bf16.mxu0 %v497_v37 }
 0x4bf   :  { %541 = vmatpush1.bf16.msra.mxu0 %v496_v38 }
 0x4c2   :  { %543 = vmatmul.mubr.bf16.vlgmr.msra.gmra.mrb[8].mxu0 %v1699_v4 }
 0x595   :  { %v544_v43 = vpop.f32.mrb[8].mxu0 }
 0x596   :  { %v545_v44 = vadd.f32 %v544_v43, %v503_v40  ;;  %v546_v45 = vpop.f32.mrb[9].mxu0 }
 0x597   :  { %v547_v46 = vadd.f32 %v546_v45, %v507_v41  ;;  %v548_v47 = vpop.f32.mrb[10].mxu0 }
 0x598   :  { %v549_v48 = vadd.f32 %v548_v47, %v503_v40  ;;  %v550_v49 = vpop.f32.mrb[11].mxu0  ;;  %v553_v53 = vmax.f32 %v545_v44, 0.0 }
 0x599   :  { %v551_v51 = vadd.f32 %v550_v49, %v507_v41  ;;  %v554_v55 = vmax.f32 %v547_v46, 0.0 }
 0x59a   :  { %v555_v54 = vmax.f32 %v549_v48, 0.0 }
 0x59b   :  { %v556_v56 = vmax.f32 %v551_v51, 0.0 }
 0x59c   :  { %v557_v57 = vpack.c.bf16 %v555_v54, %v553_v53 }
 0x59d   :  { %v558_v58 = vpack.c.bf16 %v556_v56, %v554_v55 }
 0x59e   :  { %1395 = dma.done.wait [#allocation3 + $0x1], 2048 }
 0x59f   :  { %1396 = vsyncadd [#allocation3 + $0x1], 4294965248  ;;  %622 = vmatprep.mubr.bf16.mxu1 %v558_v58  ;;  %v575_v50 = vld [vmem:[#allocation2 + $0x180] sm:$0xff]  ;;  %v576_v52 = vld [vmem:[#allocation2 + $0x190] sm:$0xff]  ;;  %s1315_s26 = scalar_lea.hbm %s1819_s9, 1024 }
 0x5a0   :  { %v567_v34 = vld [vmem:[#allocation2 + $0x100] sm:$0xff]  ;;  %962 = vmatprep.subr.bf16.mxu1 %v575_v50  ;;  %v568_v59 = vld [vmem:[#allocation2 + $0x110] sm:$0xff]  ;;  %p1316_p7 = scmp.ne.s32.totalorder %s1819_s9, %s1315_s26  ;;  %p1319_p8 = scmp.lt.u32.totalorder %s1315_s26, %s1819_s9 }
 0x5a1   :  { %963 = vmatpush3.bf16.msra.mxu1 %v567_v34  ;;  %v577_v60 = vld [vmem:[#allocation2 + $0x1a0] sm:$0xff]  ;;  %v578_v62 = vld [vmem:[#allocation2 + $0x1b0] sm:$0xff] }
 0x5a2   :  { %964 = vmatprep.subr.bf16.mxu1 %v576_v52  ;;  %v569_v61 = vld [vmem:[#allocation2 + $0x120] sm:$0xff]  ;;  %v570_v63 = vld [vmem:[#allocation2 + $0x130] sm:$0xff]  ;;  %p1321_p10 = pnand %p1319_p8, %p1316_p7 }
 0x5a3   :  { %v579_v0 = vld [vmem:[#allocation2 + $0x1c0] sm:$0xff]  ;;  %v580_v2 = vld [vmem:[#allocation2 + $0x1d0] sm:$0xff] }
 0x5a4   :  { %v571_v1 = vld [vmem:[#allocation2 + $0x140] sm:$0xff]  ;;  %v572_v4 = vld [vmem:[#allocation2 + $0x150] sm:$0xff] }
 0x5a5   :  { %v581_v5 = vld [vmem:[#allocation2 + $0x1e0] sm:$0xff]  ;;  %v582_v7 = vld [vmem:[#allocation2 + $0x1f0] sm:$0xff]  ;;  %965 = vmatpush3.bf16.msra.mxu1 %v568_v59 }
 0x5a6   :  { %v573_v6 = vld [vmem:[#allocation2 + $0x160] sm:$0xff]  ;;  %v574_v8 = vld [vmem:[#allocation2 + $0x170] sm:$0xff] }
 0x5a7   :  { %1324 = shalt.err (!%p1321_p10)  }
 0x5a8   :  { %1336 = shalt.err (!%p1245_p3)  }
 0x5a9   :  { %638 = dma.hbm_to_vmem [thread:$0]  %s1819_s9, 1024, %s1542_s29, [#allocation3 + $0x1], %s1406_s27, %s1411_s21, %s1407_s28  ;;  %966 = vmatprep.subr.bf16.mxu1 %v577_v60  ;;  %v925_v10 = vld [vmem:[#allocation7 + $0x7] ss:$0 sm:$0xff] }
 0x5aa   :  { %967 = vmatpush3.bf16.msra.mxu1 %v569_v61 }
 0x5ab   :  { %968 = vmatprep.subr.bf16.mxu1 %v578_v62 }
 0x5ae   :  { %969 = vmatpush3.bf16.msra.mxu1 %v570_v63 }
 0x5af   :  { %970 = vmatprep.subr.bf16.mxu1 %v579_v0 }
 0x5b2   :  { %971 = vmatpush3.bf16.msra.mxu1 %v571_v1 }
 0x5b3   :  { %972 = vmatprep.subr.bf16.mxu1 %v580_v2 }
 0x5b6   :  { %973 = vmatpush3.bf16.msra.mxu1 %v572_v4 }
 0x5b7   :  { %974 = vmatprep.subr.bf16.mxu1 %v581_v5 }
 0x5ba   :  { %975 = vmatpush3.bf16.msra.mxu1 %v573_v6 }
 0x5bb   :  { %976 = vmatprep.subr.bf16.mxu1 %v582_v7 }
 0x5be   :  { %977 = vmatpush3.bf16.msra.mxu1 %v574_v8 }
 0x5c1   :  { %623 = vmatmul.mubr.bf16.vlgmr.msra.gmra.mrb[8].mxu1 %v557_v57 }
 0x694   :  { %v978_v9 = vpop.f32.mrb[8].mxu1 }
 0x695   :  { %v979_v11 = vpop.f32.mrb[9].mxu1 }
 0x696   :  { %v980_v12 = vadd.f32 %v979_v11, %v978_v9  ;;  %v981_v13 = vpop.f32.mrb[10].mxu1 }
 0x697   :  { %v982_v14 = vpop.f32.mrb[11].mxu1 }
 0x698   :  { %v625_v15 = vadd.f32 %v980_v12, %v925_v10  ;;  %v983_v16 = vadd.f32 %v982_v14, %v981_v13 }
 0x69a   :  { %v628_v17 = vadd.f32 %v983_v16, %v925_v10  ;;  %v631_v18 = vmax.f32 %v625_v15, 0.0 }
 0x69c   :  { %v632_v19 = vmax.f32 %v628_v17, 0.0 }
 0x69e   :  { %v633_v20 = vpack.c.bf16 %v632_v19, %v631_v18 }
 0x69f   :  { %1397 = dma.done.wait [#allocation3], 1024 }
 0x6a0   :  { %1398 = vsyncadd [#allocation3], 4294966272  ;;  %1071 = vmatprep.subr.bf16.mxu1 %v1412_v3  ;;  %1087 = vmatprep.mubr.msk.bf16.mxu1 %vm1413_vm0, %v1412_v3  ;;  %v641_v21 = vld [vmem:[#allocation2] sm:$0xff]  ;;  %v642_v22 = vld [vmem:[#allocation2 + $0x10] sm:$0xff]  ;;  %s1337_s15 = scalar_lea.hbm %s1820_s10, 1024 }
 0x6a1   :  { %1072 = vmatpush3.bf16.msra.mxu1 %v641_v21  ;;  %v643_v23 = vld [vmem:[#allocation2 + $0x20] sm:$0xff]  ;;  %v644_v24 = vld [vmem:[#allocation2 + $0x30] sm:$0xff]  ;;  %p1338_p13 = scmp.ne.s32.totalorder %s1820_s10, %s1337_s15  ;;  %p1341_p2 = scmp.lt.u32.totalorder %s1337_s15, %s1820_s10 }
 0x6a2   :  { %v645_v25 = vld [vmem:[#allocation2 + $0x40] sm:$0xff]  ;;  %1073 = vmatprep.subr.bf16.mxu1 %v1412_v3  ;;  %v646_v26 = vld [vmem:[#allocation2 + $0x50] sm:$0xff] }
 0x6a3   :  { %v647_v27 = vld [vmem:[#allocation2 + $0x60] sm:$0xff]  ;;  %v648_v28 = vld [vmem:[#allocation2 + $0x70] sm:$0xff]  ;;  %p1343_p3 = pnand %p1341_p2, %p1338_p13 }
 0x6a5   :  { %1346 = shalt.err (!%p1343_p3)  }
 0x6a6   :  { %1358 = shalt.err (!%p1529_p9)  }
 0x6a7   :  { %750 = dma.hbm_to_vmem [thread:$0]  %s1820_s10, 1024, %s1510_s25, [#allocation3], %s1406_s27, %s1411_s21, %s1407_s28  ;;  %1074 = vmatpush3.bf16.msra.mxu1 %v642_v22  ;;  %v926_v29 = vld [vmem:[#allocation7 + $0x8] ss:$0 sm:$0xff]  ;;  %v927_v63 = vld [vmem:[#allocation7 + $0xd] ss:$0 sm:$0xff] }
 0x6a8   :  { %1075 = vmatprep.subr.bf16.mxu1 %v1412_v3  ;;  %v928_v2 = vld [vmem:[#allocation7 + $0xe] ss:$0 sm:$0xff] }
 0x6ab   :  { %1076 = vmatpush3.bf16.msra.mxu1 %v643_v23 }
 0x6ac   :  { %1077 = vmatprep.subr.bf16.mxu1 %v1412_v3 }
 0x6af   :  { %1078 = vmatpush3.bf16.msra.mxu1 %v644_v24 }
 0x6b0   :  { %1079 = vmatprep.subr.bf16.mxu1 %v1412_v3 }
 0x6b3   :  { %1080 = vmatpush3.bf16.msra.mxu1 %v645_v25 }
 0x6b4   :  { %1081 = vmatprep.subr.bf16.mxu1 %v1412_v3 }
 0x6b7   :  { %1082 = vmatpush3.bf16.msra.mxu1 %v646_v26 }
 0x6b8   :  { %1083 = vmatprep.subr.bf16.mxu1 %v1412_v3 }
 0x6bb   :  { %1084 = vmatpush3.bf16.msra.mxu1 %v647_v27 }
 0x6bc   :  { %1085 = vmatprep.subr.bf16.mxu1 %v1412_v3 }
 0x6bf   :  { %1086 = vmatpush3.bf16.msra.mxu1 %v648_v28 }
 0x6c2   :  { %1088 = vmatmul.mubr.bf16.vlgmr.msra.gmra.mrb[12].mxu1 %v633_v20 }
 0x795   :  { %v690_v30 = vpop.f32.mrb[12].mxu1 }
 0x796   :  { %v1089_v31 = vpop.f32.mrb[13].mxu1  ;;  %v691_v33 = vadd.f32 %v926_v29, %v690_v30 }
 0x797   :  { %v693_v32 = vpop.f32.mrb[14].mxu1 }
 0x798   :  { %v694_v35 = vadd.f32 %v926_v29, %v693_v32  ;;  %v1090_v36 = vpop.f32.mrb[15].mxu1  ;;  %v697_v38 = vmax.f32 %v691_v33, 0.0 }
 0x79a   :  { %v698_v37 = vmax.f32 %v694_v35, 0.0 }
 0x79c   :  { %v700_v39 = vmul.f32 %v1643_v42, %v698_v37 }
 0x79e   :  { %v701_v40 = vadd.f32 %v700_v39, %v697_v38 }
 0x7a0   :  { %v702_v41 = vrot.slane %v701_v40, 4 }
 0x7a2   :  { %v703_v43 = vadd.f32 %v702_v41, %v701_v40 }
 0x7a4   :  { %v704_v44 = vrot.slane %v703_v43, 2 }
 0x7a6   :  { %v705_v45 = vadd.f32 %v704_v44, %v703_v43 }
 0x7a8   :  { %v706_v46 = vrot.slane %v705_v45, 1 }
 0x7aa   :  { %v707_v47 = vadd.f32 %v706_v46, %v705_v45 }
 0x7ac   :  { %v708_v48 = vmul.f32 0.07692308, %v707_v47 }
 0x7ae   :  { %v709_v49 = vsub.f32 %v697_v38, %v708_v48  ;;  %v710_v51 = vsub.f32 %v698_v37, %v708_v48 }
 0x7b0   :  { %v712_v53 = vmul.f32 %v710_v51, %v710_v51  ;;  %v711_v54 = vmul.f32 %v709_v49, %v709_v49 }
 0x7b2   :  { %v714_v55 = vmul.f32 %v1643_v42, %v712_v53 }
 0x7b4   :  { %v715_v56 = vadd.f32 %v714_v55, %v711_v54 }
 0x7b6   :  { %v716_v57 = vrot.slane %v715_v56, 4 }
 0x7b8   :  { %v717_v58 = vadd.f32 %v716_v57, %v715_v56 }
 0x7ba   :  { %v718_v50 = vrot.slane %v717_v58, 2 }
 0x7bc   :  { %v719_v34 = vadd.f32 %v718_v50, %v717_v58 }
 0x7be   :  { %v720_v52 = vrot.slane %v719_v34, 1 }
 0x7c0   :  { %v721_v59 = vadd.f32 %v720_v52, %v719_v34 }
 0x7c2   :  { %v722_v60 = vmul.f32 0.07692308, %v721_v59 }
 0x7c4   :  { %v723_v61 = vadd.f32 1e-05, %v722_v60 }
 0x7c6   :  { %1151 = vrsqrt.f32 %v723_v61 }
 0x7d0   :  { %v1152_v62 = vpop.eup %1151 }
 0x7d1   :  { %v725_v0 = vmul.f32 %v1152_v62, %v709_v49  ;;  %v726_v1 = vmul.f32 %v1152_v62, %v710_v51 }
 0x7d3   :  { %v734_v4 = vmul.f32 %v927_v63, %v725_v0  ;;  %v735_v5 = vmul.f32 %v927_v63, %v726_v1 }
 0x7d5   :  { %v743_v6 = vadd.f32 %v928_v2, %v734_v4  ;;  %v744_v7 = vadd.f32 %v928_v2, %v735_v5 }
 0x7d7   :  { %v745_v42 = vpack.c.bf16 %v744_v7, %v743_v6 }
 0x7d8   :  { %1399 = dma.done.wait [#allocation3 + $0x1], 1024 }
 0x7d9   :  { %1400 = vsyncadd [#allocation3 + $0x1], 4294966272  ;;  %1091 = vmatprep.subr.bf16.mxu0 %v1412_v3  ;;  %1107 = vmatprep.mubr.msk.bf16.mxu0 %vm1413_vm0, %v1412_v3  ;;  %v753_v8 = vld [vmem:[#allocation2 + $0x100] sm:$0xff]  ;;  %v754_v9 = vld [vmem:[#allocation2 + $0x110] sm:$0xff] }
 0x7da   :  { %1092 = vmatpush3.bf16.msra.mxu0 %v753_v8  ;;  %v755_v10 = vld [vmem:[#allocation2 + $0x120] sm:$0xff]  ;;  %v756_v11 = vld [vmem:[#allocation2 + $0x130] sm:$0xff]  ;;  %v929_v16 = vld [vmem:[#allocation7 + $0x9] ss:$0 sm:$0xff] }
 0x7db   :  { %1093 = vmatprep.subr.bf16.mxu0 %v1412_v3  ;;  %v757_v12 = vld [vmem:[#allocation2 + $0x140] sm:$0xff]  ;;  %v758_v13 = vld [vmem:[#allocation2 + $0x150] sm:$0xff] }
 0x7dc   :  { %v759_v14 = vld [vmem:[#allocation2 + $0x160] sm:$0xff]  ;;  %v760_v15 = vld [vmem:[#allocation2 + $0x170] sm:$0xff] }
 0x7de   :  { %1094 = vmatpush3.bf16.msra.mxu0 %v754_v9 }
 0x7df   :  { %1095 = vmatprep.subr.bf16.mxu0 %v1412_v3 }
 0x7e2   :  { %1096 = vmatpush3.bf16.msra.mxu0 %v755_v10 }
 0x7e3   :  { %1097 = vmatprep.subr.bf16.mxu0 %v1412_v3 }
 0x7e6   :  { %1098 = vmatpush3.bf16.msra.mxu0 %v756_v11 }
 0x7e7   :  { %1099 = vmatprep.subr.bf16.mxu0 %v1412_v3 }
 0x7ea   :  { %1100 = vmatpush3.bf16.msra.mxu0 %v757_v12 }
 0x7eb   :  { %1101 = vmatprep.subr.bf16.mxu0 %v1412_v3 }
 0x7ee   :  { %1102 = vmatpush3.bf16.msra.mxu0 %v758_v13 }
 0x7ef   :  { %1103 = vmatprep.subr.bf16.mxu0 %v1412_v3 }
 0x7f2   :  { %1104 = vmatpush3.bf16.msra.mxu0 %v759_v14 }
 0x7f3   :  { %1105 = vmatprep.subr.bf16.mxu0 %v1412_v3 }
 0x7f6   :  { %1106 = vmatpush3.bf16.msra.mxu0 %v760_v15 }
 0x7f9   :  { %1108 = vmatmul.mubr.bf16.vlgmr.msra.gmra.mrb[12].mxu0 %v745_v42 }
 0x8cc   :  { %v802_v17 = vpop.f32.mrb[12].mxu0 }
 0x8cd   :  { %v803_v18 = vadd.f32 %v929_v16, %v802_v17  ;;  %v1109_v19 = vpop.f32.mrb[13].mxu0 }
 0x8ce   :  { %v805_v20 = vpop.f32.mrb[14].mxu0 }
 0x8cf   :  { %v806_v21 = vadd.f32 %v929_v16, %v805_v20  ;;  %v1110_v22 = vpop.f32.mrb[15].mxu0  ;;  %v809_v23 = vmax.f32 %v803_v18, 0.0 }
 0x8d1   :  { %v810_v24 = vmax.f32 %v806_v21, 0.0 }
 0x8d3   :  { %v811_v25 = vpack.c.bf16 %v810_v24, %v809_v23 }
 0x8d4   :  { %1401 = dma.done.wait [#allocation3], 1024 }
 0x8d5   :  { %1402 = vsyncadd [#allocation3], 4294966272  ;;  %1111 = vmatprep.subr.bf16.mxu1 %v1412_v3  ;;  %1127 = vmatprep.mubr.msk.bf16.mxu1 %vm1413_vm0, %v1412_v3  ;;  %v814_v26 = vld [vmem:[#allocation2] sm:$0xff]  ;;  %v815_v27 = vld [vmem:[#allocation2 + $0x10] sm:$0xff]  ;;  %s1422_s10 = smov [#allocation9]  }
 0x8d6   :  { %1112 = vmatpush3.bf16.msra.mxu1 %v814_v26  ;;  %v816_v28 = vld [vmem:[#allocation2 + $0x20] sm:$0xff]  ;;  %v817_v29 = vld [vmem:[#allocation2 + $0x30] sm:$0xff]  ;;  %v930_v35 = vld [vmem:[#allocation7 + $0xa] ss:$0 sm:$0xff]  ;;  %s889_s25 = sshll.u32 %s1422_s10, 4  ;;  %s890_s25 = int_to_ptr.vmem [resolvable:$true] %s889_s25 }
 0x8d7   :  { %1113 = vmatprep.subr.bf16.mxu1 %v1412_v3  ;;  %v818_v30 = vld [vmem:[#allocation2 + $0x40] sm:$0xff]  ;;  %v819_v31 = vld [vmem:[#allocation2 + $0x50] sm:$0xff]  ;;  %s1359_s20 = scalar_lea.vmem %s890_s25, 256  ;;  %p1364_p11 = scmp.lt.s32.totalorder %s890_s25, %s890_s25 }
 0x8d8   :  { %v820_v32 = vld [vmem:[#allocation2 + $0x60] sm:$0xff]  ;;  %v821_v33 = vld [vmem:[#allocation2 + $0x70] sm:$0xff]  ;;  %p1360_p9 = scmp.ne.s32.totalorder %s890_s25, %s1359_s20  ;;  %p1365_p12 = scmp.lt.s32.totalorder %s1359_s20, %s1359_s20 }
 0x8da   :  { %1114 = vmatpush3.bf16.msra.mxu1 %v815_v27  ;;  %p1366_p1 = por %p1365_p12, %p1364_p11 }
 0x8db   :  { %1115 = vmatprep.subr.bf16.mxu1 %v1412_v3 }
 0x8dc   :  { %p1367_p4 = pnand %p1366_p1, %p1360_p9 }
 0x8de   :  { %1116 = vmatpush3.bf16.msra.mxu1 %v816_v28 }
 0x8df   :  { %1117 = vmatprep.subr.bf16.mxu1 %v1412_v3 }
 0x8e2   :  { %1118 = vmatpush3.bf16.msra.mxu1 %v817_v29 }
 0x8e3   :  { %1119 = vmatprep.subr.bf16.mxu1 %v1412_v3 }
 0x8e6   :  { %1120 = vmatpush3.bf16.msra.mxu1 %v818_v30 }
 0x8e7   :  { %1121 = vmatprep.subr.bf16.mxu1 %v1412_v3 }
 0x8ea   :  { %1122 = vmatpush3.bf16.msra.mxu1 %v819_v31 }
 0x8eb   :  { %1123 = vmatprep.subr.bf16.mxu1 %v1412_v3 }
 0x8ee   :  { %1124 = vmatpush3.bf16.msra.mxu1 %v820_v32 }
 0x8ef   :  { %1125 = vmatprep.subr.bf16.mxu1 %v1412_v3 }
 0x8f2   :  { %1126 = vmatpush3.bf16.msra.mxu1 %v821_v33 }
 0x8f5   :  { %1128 = vmatmul.mubr.bf16.vlgmr.msra.gmra.mrb[16].mxu1 %v811_v25 }
 0x9c8   :  { %v863_v36 = vpop.f32.mrb[16].mxu1 }
 0x9c9   :  { %v864_v37 = vadd.f32 %v930_v35, %v863_v36  ;;  %v1129_v38 = vpop.f32.mrb[17].mxu1 }
 0x9ca   :  { %v866_v39 = vpop.f32.mrb[18].mxu1 }
 0x9cb   :  { %v931_v40 = vmul.f32 -1.442695, %v864_v37  ;;  %v867_v41 = vadd.f32 %v930_v35, %v866_v39  ;;  %v1130_v43 = vpop.f32.mrb[19].mxu1 }
 0x9cd   :  { %1153 = vpow2.f32 %v931_v40  ;;  %v932_v44 = vmul.f32 -1.442695, %v867_v41 }
 0x9cf   :  { %1155 = vpow2.f32 %v932_v44 }
 0x9d7   :  { %v1154_v45 = vpop.eup %1153 }
 0x9d8   :  { %v876_v46 = vadd.f32 1.0, %v1154_v45 }
 0x9d9   :  { %v1156_v47 = vpop.eup %1155 }
 0x9da   :  { %1157 = vrcp.f32 %v876_v46  ;;  %v877_v48 = vadd.f32 1.0, %v1156_v47 }
 0x9dc   :  { %1159 = vrcp.f32 %v877_v48 }
 0x9e4   :  { %v1158_v3 = vpop.eup %1157 }
 0x9e5   :  { %882 = vst [vmem:[#allocation9] sm:$0xff] %v1158_v3 }
 0x9e6   :  { %v1160_v49 = vpop.eup %1159 }
 0x9e7   :  { %883 = vst [vmem:[#allocation9 + $0x8] sm:$0xff] %v1160_v49 }
 0x9e8   :  { %1370 = shalt.err (!%p1367_p4)
}
 0x9e9   :  { %s1371_s0 = scalar_lea.hbm %s1821_s11, 256 }
 0x9ea   :  { %p1372_p0 = scmp.ne.s32.totalorder %s1821_s11, %s1371_s0  ;;  %p1375_p5 = scmp.lt.u32.totalorder %s1371_s0, %s1821_s11 }
 0x9ec   :  { %p1377_p6 = pnand %p1375_p5, %p1372_p0 }
 0x9ee   :  { %1380 = shalt.err (!%p1377_p6)
}
 0x9ef   :  { %895 = dma.vmem_to_hbm [thread:$0]  %s890_s25, 256, %s1821_s11, [#allocation6], %s1406_s27, %s1406_s27, %s1407_s28  }
 0x9f0   :  { %1403 = dma.done.wait [#allocation6], 256  }
 0x9f1   :  { %1404 = vsyncadd [#allocation6], 4294967040 }
 0x9f2   :  { %899 = vsyncpa [#allocation5], 1 }
 0x9f3   :  { %900 = vsyncpa [#allocation8], 1 }
 0x9f4   :  { %901 = vsyncpa [#allocation6], 1 }
 0x9f5   :  { %902 = vsyncmov [#allocation3] }
 0x9f8   :  { %s903_s26 = vpop.sfrf %902 }
 0x9f9   :  { %p933_p7 = scmp.ne.s32.totalorder %s903_s26, 0 }
 0x9fb   :  { %907 = shalt.err (%p933_p7)  }
 0x9fc   :  { %909 = vsyncmov [#allocation3 + $0x1] }
 0x9ff   :  { %s910_s30 = vpop.sfrf %909 }
 0xa00   :  { %p934_p8 = scmp.ne.s32.totalorder %s910_s30, 0 }
 0xa02   :  { %914 = shalt.err (%p934_p8)  }

</bundles_post_ra>
